<compile_context>
chip_gen: v7x
topology: tpu7x:2x2x1
jax: 0.10.0
libtpu: 0.0.40
codegen_flags: <defaults>
</compile_context>

<pallas_src>
import functools

import jax
import jax.numpy as jnp
from jax import lax
from jax.experimental import pallas as pl
from jax.experimental.pallas import tpu as pltpu


_INV_SQRT2 = 0.7071067811865476


def _erf_poly(x):
    # Abramowitz & Stegun 7.1.26 rational approximation of erf, |err| < 1.5e-7.
    # (Used instead of lax.erf so the kernel lowers cleanly in Mosaic; the
    # resulting GELU matches PyTorch's exact-erf GELU well within f32 tolerance.)
    p = 0.3275911
    a1, a2, a3, a4, a5 = (0.254829592, -0.284496736, 1.421413741,
                          -1.453152027, 1.061405429)
    ax = jnp.abs(x)
    t = 1.0 / (1.0 + p * ax)
    poly = ((((a5 * t + a4) * t + a3) * t + a2) * t + a1) * t
    y = 1.0 - poly * jnp.exp(-ax * ax)
    return jnp.where(x >= 0, y, -y)


def _gelu_exact(x):
    return 0.5 * x * (1.0 + _erf_poly(x * _INV_SQRT2))


def _mapping_kernel(lr_mul, eps):
    def kernel(x_ref, w_ref, b_ref, g_ref, beta_ref, o_ref, act_ref):
        layer = pl.program_id(1)

        # First layer of this batch tile: load the input into the f32 scratch.
        @pl.when(layer == 0)
        def _():
            act_ref[...] = x_ref[...].astype(jnp.float32)

        act = act_ref[...]                                  # (B_T, D) f32
        w = w_ref[0].astype(jnp.float32)                    # (D_in, D_out)
        b = b_ref[0].astype(jnp.float32)                    # (1, D)

        # EqualLinear: lr_mul * (x @ W.T + b)
        h = (jnp.dot(act, w, preferred_element_type=jnp.float32) + b) * lr_mul
        # GELU (exact, erf-based)
        h = _gelu_exact(h)
        # LayerNorm over the feature dim
        m = jnp.mean(h, axis=-1, keepdims=True)
        d = h - m
        v = jnp.mean(d * d, axis=-1, keepdims=True)
        y = d * lax.rsqrt(v + eps)
        act_ref[...] = y * g_ref[0].astype(jnp.float32) + beta_ref[0].astype(jnp.float32)

        # Last layer: write the resident output block in the input dtype.
        @pl.when(layer == pl.num_programs(1) - 1)
        def _():
            o_ref[...] = act_ref[...].astype(o_ref.dtype)

    return kernel


def _round_up(x, m):
    return (x + m - 1) // m * m


def mapping_network(x, weights, biases, ln_gamma, ln_beta,
                    *, lr_mul=0.1, eps=1e-5, block_b=256):
    """x: (B, D).  weights: (L, D, D) stored (out, in) like nn.Linear.
    biases/ln_gamma/ln_beta: (L, D)."""
    B, D = x.shape
    L = weights.shape[0]
    assert weights.shape == (L, D, D)

    # Layout plumbing (outside the kernel):
    #  * weights -> (layer, in, out) so the kernel does a plain (m,k)@(k,n) dot.
    #  * per-layer vectors -> (L, 1, D) so their blocks are (1, 1, D) and the
    #    last two dims equal the full array dims (satisfies the (8,128) rule).
    w_t = jnp.swapaxes(weights, 1, 2)
    b3 = biases.reshape(L, 1, D)
    g3 = ln_gamma.reshape(L, 1, D)
    be3 = ln_beta.reshape(L, 1, D)

    # Batch tiling: sublane-aligned tile, pad batch to a multiple of it.
    bt = min(_round_up(B, 8), _round_up(block_b, 8))
    Bp = _round_up(B, bt)
    x_p = x if Bp == B else jnp.pad(x, ((0, Bp - B), (0, 0)))

    out = pl.pallas_call(
        _mapping_kernel(lr_mul, eps),
        out_shape=jax.ShapeDtypeStruct((Bp, D), x.dtype),
        grid_spec=pltpu.PrefetchScalarGridSpec(
            num_scalar_prefetch=0,
            grid=(Bp // bt, L),
            in_specs=[
                pl.BlockSpec((bt, D), lambda i, l: (i, 0)),       # x (fetched once per tile)
                pl.BlockSpec((1, D, D), lambda i, l: (l, 0, 0)),  # layer weight
                pl.BlockSpec((1, 1, D), lambda i, l: (l, 0, 0)),  # layer bias
                pl.BlockSpec((1, 1, D), lambda i, l: (l, 0, 0)),  # LN gamma
                pl.BlockSpec((1, 1, D), lambda i, l: (l, 0, 0)),  # LN beta
            ],
            out_specs=pl.BlockSpec((bt, D), lambda i, l: (i, 0)),
            scratch_shapes=[pltpu.VMEM((bt, D), jnp.float32)],
        ),
        compiler_params=pltpu.CompilerParams(
            dimension_semantics=("parallel", "arbitrary"),
        ),
    )(x_p, w_t, b3, g3, be3)

    return out[:B] if Bp != B else out


def mapping_network_ref(x, weights, biases, ln_gamma, ln_beta,
                        *, lr_mul=0.1, eps=1e-5):
    h = x.astype(jnp.float32)
    for l in range(weights.shape[0]):
        z = (jnp.dot(h, weights[l].T, precision=lax.Precision.HIGHEST)
             + biases[l]) * lr_mul
        z = jax.nn.gelu(z, approximate=False)
        m = jnp.mean(z, axis=-1, keepdims=True)
        v = jnp.mean((z - m) ** 2, axis=-1, keepdims=True)
        h = (z - m) * lax.rsqrt(v + eps) * ln_gamma[l] + ln_beta[l]
    return h.astype(x.dtype)


if __name__ == "__main__":
    # Module defaults: style_dim=512, num_layers=8; small batch.
    B, D, L = 8, 512, 8
    lr_mul = 0.1

    key = jax.random.PRNGKey(0)
    k_x, k_w, k_b, k_g, k_be = jax.random.split(key, 5)
    x = jax.random.normal(k_x, (B, D), dtype=jnp.float32)
    weights = jax.random.normal(k_w, (L, D, D), dtype=jnp.float32)   # (out, in), like torch.randn
    biases = 0.5 * jax.random.normal(k_b, (L, D), dtype=jnp.float32)
    ln_gamma = 1.0 + 0.1 * jax.random.normal(k_g, (L, D), dtype=jnp.float32)
    ln_beta = 0.1 * jax.random.normal(k_be, (L, D), dtype=jnp.float32)

    out = mapping_network(x, weights, biases, ln_gamma, ln_beta, lr_mul=lr_mul)
    out = jax.block_until_ready(out)

    ref = mapping_network_ref(x, weights, biases, ln_gamma, ln_beta, lr_mul=lr_mul)
    assert out.shape == (B, D)
    # Loose bound only to absorb possible MXU-pass vs HIGHEST-precision XLA
    # reference differences across 8 chained matmul+LayerNorm layers; typical
    # observed max-abs diff is ~1e-4 on f32.
    max_diff = jnp.max(jnp.abs(out - ref))
    assert jnp.allclose(out, ref, atol=5e-2, rtol=5e-2), (
        f"mismatch vs reference, max abs diff = {max_diff}")
    print("KERNEL_OK")
</pallas_src>

<mosaic_0001>
module attributes {stable_mosaic.version = 11 : i64} {
  func.func @kernel(%arg0: i32, %arg1: i32, %arg2: memref<8x512xf32, #tpu.memory_space<vmem>>, %arg3: memref<1x512x512xf32, #tpu.memory_space<vmem>>, %arg4: memref<1x1x512xf32, #tpu.memory_space<vmem>>, %arg5: memref<1x1x512xf32, #tpu.memory_space<vmem>>, %arg6: memref<1x1x512xf32, #tpu.memory_space<vmem>>, %arg7: memref<8x512xf32, #tpu.memory_space<vmem>>, %arg8: memref<8x512xf32, #tpu.memory_space<vmem>>) attributes {dimension_semantics = [#tpu.dimension_semantics<parallel>, #tpu.dimension_semantics<arbitrary>], iteration_bounds = array<i64: 1, 8>, scalar_prefetch = 0 : i64, scratch_operands = 1 : i64, tpu.core_type = #tpu.core_type<tc>, window_params = [{transform_indices = @transform_0, window_bounds = array<i64: 8, 512>}, {transform_indices = @transform_1, window_bounds = array<i64: 1, 512, 512>}, {transform_indices = @transform_2, window_bounds = array<i64: 1, 1, 512>}, {transform_indices = @transform_3, window_bounds = array<i64: 1, 1, 512>}, {transform_indices = @transform_4, window_bounds = array<i64: 1, 1, 512>}, {transform_indices = @transform_5, window_bounds = array<i64: 8, 512>}]} {
    %c0_i32 = arith.constant 0 : i32
    %0 = arith.cmpi eq, %arg1, %c0_i32 : i32
    %1 = arith.extui %0 : i1 to i32
    %c0_i32_0 = arith.constant 0 : i32
    %2 = arith.cmpi ne, %1, %c0_i32_0 : i32
    scf.if %2 {
      %c0_38 = arith.constant 0 : index
      %c0_39 = arith.constant 0 : index
      %81 = vector.load %arg2[%c0_38, %c0_39] : memref<8x512xf32, #tpu.memory_space<vmem>>, vector<8x512xf32>
      %c0_40 = arith.constant 0 : index
      %c0_41 = arith.constant 0 : index
      %82 = vector.load %arg8[%c0_40, %c0_41] : memref<8x512xf32, #tpu.memory_space<vmem>>, vector<8x512xf32>
      tpu.vector_store %arg8[%c0_40, %c0_41], %81 {strides = array<i32>} : memref<8x512xf32, #tpu.memory_space<vmem>>, vector<8x512xf32>,
    } else {
    }
    %c0 = arith.constant 0 : index
    %c0_1 = arith.constant 0 : index
    %3 = vector.load %arg8[%c0, %c0_1] : memref<8x512xf32, #tpu.memory_space<vmem>>, vector<8x512xf32>
    %c0_2 = arith.constant 0 : index
    %c0_3 = arith.constant 0 : index
    %c0_4 = arith.constant 0 : index
    %4 = vector.load %arg3[%c0_2, %c0_3, %c0_4] : memref<1x512x512xf32, #tpu.memory_space<vmem>>, vector<1x512x512xf32>
    %5 = vector.shape_cast %4 : vector<1x512x512xf32> to vector<512x512xf32>
    %c0_5 = arith.constant 0 : index
    %c0_6 = arith.constant 0 : index
    %c0_7 = arith.constant 0 : index
    %6 = vector.load %arg4[%c0_5, %c0_6, %c0_7] : memref<1x1x512xf32, #tpu.memory_space<vmem>>, vector<1x1x512xf32>
    %7 = vector.shape_cast %6 : vector<1x1x512xf32> to vector<1x512xf32>
    %cst = arith.constant dense<0.000000e+00> : vector<8x512xf32>
    %8 = tpu.matmul %3, %5, %cst {dimension_numbers = #tpu.dot_dimension_numbers<[1], [0], [0], [1], [0, 0, 1, 1], [], []>} : vector<8x512xf32>, vector<512x512xf32>, vector<8x512xf32> -> vector<8x512xf32>
    %9 = vector.broadcast %7 : vector<1x512xf32> to vector<8x512xf32>
    %10 = arith.addf %8, %9 : vector<8x512xf32>
    %cst_8 = arith.constant 1.000000e-01 : f32
    %11 = vector.broadcast %cst_8 : f32 to vector<8x512xf32>
    %12 = arith.mulf %10, %11 : vector<8x512xf32>
    %cst_9 = arith.constant 5.000000e-01 : f32
    %13 = vector.broadcast %cst_9 : f32 to vector<8x512xf32>
    %14 = arith.mulf %13, %12 : vector<8x512xf32>
    %cst_10 = arith.constant 0.707106769 : f32
    %15 = vector.broadcast %cst_10 : f32 to vector<8x512xf32>
    %16 = arith.mulf %12, %15 : vector<8x512xf32>
    %17 = math.absf %16 : vector<8x512xf32>
    %cst_11 = arith.constant 0.327591091 : f32
    %18 = vector.broadcast %cst_11 : f32 to vector<8x512xf32>
    %19 = arith.mulf %18, %17 : vector<8x512xf32>
    %cst_12 = arith.constant 1.000000e+00 : f32
    %20 = vector.broadcast %cst_12 : f32 to vector<8x512xf32>
    %21 = arith.addf %20, %19 : vector<8x512xf32>
    %cst_13 = arith.constant 1.000000e+00 : f32
    %22 = vector.broadcast %cst_13 : f32 to vector<8x512xf32>
    %23 = arith.divf %22, %21 : vector<8x512xf32>
    %cst_14 = arith.constant 1.06140542 : f32
    %24 = vector.broadcast %cst_14 : f32 to vector<8x512xf32>
    %25 = arith.mulf %24, %23 : vector<8x512xf32>
    %cst_15 = arith.constant -1.45315206 : f32
    %26 = vector.broadcast %cst_15 : f32 to vector<8x512xf32>
    %27 = arith.addf %25, %26 : vector<8x512xf32>
    %28 = arith.mulf %27, %23 : vector<8x512xf32>
    %cst_16 = arith.constant 1.42141378 : f32
    %29 = vector.broadcast %cst_16 : f32 to vector<8x512xf32>
    %30 = arith.addf %28, %29 : vector<8x512xf32>
    %31 = arith.mulf %30, %23 : vector<8x512xf32>
    %cst_17 = arith.constant -0.284496725 : f32
    %32 = vector.broadcast %cst_17 : f32 to vector<8x512xf32>
    %33 = arith.addf %31, %32 : vector<8x512xf32>
    %34 = arith.mulf %33, %23 : vector<8x512xf32>
    %cst_18 = arith.constant 0.254829586 : f32
    %35 = vector.broadcast %cst_18 : f32 to vector<8x512xf32>
    %36 = arith.addf %34, %35 : vector<8x512xf32>
    %37 = arith.mulf %36, %23 : vector<8x512xf32>
    %cst_19 = arith.constant 0.000000e+00 : f32
    %38 = vector.broadcast %cst_19 : f32 to vector<8x512xf32>
    %39 = arith.subf %38, %17 : vector<8x512xf32>
    %40 = arith.mulf %39, %17 : vector<8x512xf32>
    %41 = math.exp %40 : vector<8x512xf32>
    %42 = arith.mulf %37, %41 : vector<8x512xf32>
    %cst_20 = arith.constant 1.000000e+00 : f32
    %43 = vector.broadcast %cst_20 : f32 to vector<8x512xf32>
    %44 = arith.subf %43, %42 : vector<8x512xf32>
    %cst_21 = arith.constant 0.000000e+00 : f32
    %45 = vector.broadcast %cst_21 : f32 to vector<8x512xf32>
    %46 = arith.cmpf oge, %16, %45 : vector<8x512xf32>
    %cst_22 = arith.constant 0.000000e+00 : f32
    %47 = vector.broadcast %cst_22 : f32 to vector<8x512xf32>
    %48 = arith.subf %47, %44 : vector<8x512xf32>
    %49 = arith.select %46, %44, %48 : vector<8x512xi1>, vector<8x512xf32>
    %cst_23 = arith.constant 1.000000e+00 : f32
    %50 = vector.broadcast %cst_23 : f32 to vector<8x512xf32>
    %51 = arith.addf %50, %49 : vector<8x512xf32>
    %52 = arith.mulf %14, %51 : vector<8x512xf32>
    %cst_24 = arith.constant dense<0.000000e+00> : vector<8xf32>
    %53 = vector.multi_reduction <add>, %52, %cst_24 [1] : vector<8x512xf32> to vector<8xf32>
    %54 = vector.shape_cast %53 : vector<8xf32> to vector<8x1xf32>
    %cst_25 = arith.constant 5.120000e+02 : f32
    %55 = vector.broadcast %cst_25 : f32 to vector<8x1xf32>
    %56 = arith.divf %54, %55 : vector<8x1xf32>
    %57 = vector.broadcast %56 : vector<8x1xf32> to vector<8x512xf32>
    %58 = arith.subf %52, %57 : vector<8x512xf32>
    %59 = arith.mulf %58, %58 : vector<8x512xf32>
    %cst_26 = arith.constant dense<0.000000e+00> : vector<8xf32>
    %60 = vector.multi_reduction <add>, %59, %cst_26 [1] : vector<8x512xf32> to vector<8xf32>
    %61 = vector.shape_cast %60 : vector<8xf32> to vector<8x1xf32>
    %cst_27 = arith.constant 5.120000e+02 : f32
    %62 = vector.broadcast %cst_27 : f32 to vector<8x1xf32>
    %63 = arith.divf %61, %62 : vector<8x1xf32>
    %cst_28 = arith.constant 9.99999974E-6 : f32
    %64 = vector.broadcast %cst_28 : f32 to vector<8x1xf32>
    %65 = arith.addf %63, %64 : vector<8x1xf32>
    %66 = math.rsqrt %65 : vector<8x1xf32>
    %67 = vector.broadcast %66 : vector<8x1xf32> to vector<8x512xf32>
    %68 = arith.mulf %58, %67 : vector<8x512xf32>
    %c0_29 = arith.constant 0 : index
    %c0_30 = arith.constant 0 : index
    %c0_31 = arith.constant 0 : index
    %69 = vector.load %arg5[%c0_29, %c0_30, %c0_31] : memref<1x1x512xf32, #tpu.memory_space<vmem>>, vector<1x1x512xf32>
    %70 = vector.shape_cast %69 : vector<1x1x512xf32> to vector<1x512xf32>
    %71 = vector.broadcast %70 : vector<1x512xf32> to vector<8x512xf32>
    %72 = arith.mulf %68, %71 : vector<8x512xf32>
    %c0_32 = arith.constant 0 : index
    %c0_33 = arith.constant 0 : index
    %c0_34 = arith.constant 0 : index
    %73 = vector.load %arg6[%c0_32, %c0_33, %c0_34] : memref<1x1x512xf32, #tpu.memory_space<vmem>>, vector<1x1x512xf32>
    %74 = vector.shape_cast %73 : vector<1x1x512xf32> to vector<1x512xf32>
    %75 = vector.broadcast %74 : vector<1x512xf32> to vector<8x512xf32>
    %76 = arith.addf %72, %75 : vector<8x512xf32>
    %c0_35 = arith.constant 0 : index
    %c0_36 = arith.constant 0 : index
    %77 = vector.load %arg8[%c0_35, %c0_36] : memref<8x512xf32, #tpu.memory_space<vmem>>, vector<8x512xf32>
    tpu.vector_store %arg8[%c0_35, %c0_36], %76 {strides = array<i32>} : memref<8x512xf32, #tpu.memory_space<vmem>>, vector<8x512xf32>,
    %c7_i32 = arith.constant 7 : i32
    %78 = arith.cmpi eq, %arg1, %c7_i32 : i32
    %79 = arith.extui %78 : i1 to i32
    %c0_i32_37 = arith.constant 0 : i32
    %80 = arith.cmpi ne, %79, %c0_i32_37 : i32
    scf.if %80 {
      %c0_38 = arith.constant 0 : index
      %c0_39 = arith.constant 0 : index
      %81 = vector.load %arg8[%c0_38, %c0_39] : memref<8x512xf32, #tpu.memory_space<vmem>>, vector<8x512xf32>
      %c0_40 = arith.constant 0 : index
      %c0_41 = arith.constant 0 : index
      %82 = vector.load %arg7[%c0_40, %c0_41] : memref<8x512xf32, #tpu.memory_space<vmem>>, vector<8x512xf32>
      tpu.vector_store %arg7[%c0_40, %c0_41], %81 {strides = array<i32>} : memref<8x512xf32, #tpu.memory_space<vmem>>, vector<8x512xf32>,
    } else {
    }
    return
  }
  func.func @transform_0(%arg0: i32, %arg1: i32) -> (i32, i32) {
    %c0_i32 = arith.constant 0 : i32
    %c0_i32_0 = arith.constant 0 : i32
    return %arg0, %c0_i32 : i32, i32
  }
  func.func @transform_1(%arg0: i32, %arg1: i32) -> (i32, i32, i32) {
    %c0_i32 = arith.constant 0 : i32
    %c0_i32_0 = arith.constant 0 : i32
    %c0_i32_1 = arith.constant 0 : i32
    return %arg1, %c0_i32, %c0_i32_0 : i32, i32, i32
  }
  func.func @transform_2(%arg0: i32, %arg1: i32) -> (i32, i32, i32) {
    %c0_i32 = arith.constant 0 : i32
    %c0_i32_0 = arith.constant 0 : i32
    %c0_i32_1 = arith.constant 0 : i32
    return %arg1, %c0_i32, %c0_i32_0 : i32, i32, i32
  }
  func.func @transform_3(%arg0: i32, %arg1: i32) -> (i32, i32, i32) {
    %c0_i32 = arith.constant 0 : i32
    %c0_i32_0 = arith.constant 0 : i32
    %c0_i32_1 = arith.constant 0 : i32
    return %arg1, %c0_i32, %c0_i32_0 : i32, i32, i32
  }
  func.func @transform_4(%arg0: i32, %arg1: i32) -> (i32, i32, i32) {
    %c0_i32 = arith.constant 0 : i32
    %c0_i32_0 = arith.constant 0 : i32
    %c0_i32_1 = arith.constant 0 : i32
    return %arg1, %c0_i32, %c0_i32_0 : i32, i32, i32
  }
  func.func @transform_5(%arg0: i32, %arg1: i32) -> (i32, i32) {
    %c0_i32 = arith.constant 0 : i32
    %c0_i32_0 = arith.constant 0 : i32
    return %arg0, %c0_i32 : i32, i32
  }
}

</mosaic_0001>

<bundles_post_ra>
// kernel: tpu_custom_call.1
= control target key start
LH: loop header
LB: loop body
LE: loop exit
PB: predicated region body
PF: predicated region fallthrough
CT: control target
= control target key end

     0   :  { %s2592_s0 = inlined_call_operand.hbm [shape: f32[8,512], index: 0, kind: input, shape index: {}]   ;;  %s2593_s1 = inlined_call_operand.hbm [shape: f32[8,512,512], index: 1, kind: input, shape index: {}]   ;;  %s2594_s2 = inlined_call_operand.hbm [shape: f32[8,1,512], index: 2, kind: input, shape index: {}]   ;;  %s2595_s3 = inlined_call_operand.hbm [shape: f32[8,1,512], index: 3, kind: input, shape index: {}]   ;;  %s2596_s4 = inlined_call_operand.hbm [shape: f32[8,1,512], index: 4, kind: input, shape index: {}]   ;;  %s2597_s5 = inlined_call_operand.hbm [shape: f32[8,512], index: 5, kind: output, shape index: {}]  }
   0x1   :  { %2608 = sst [smem:[#allocation19_spill]] %s2593_s1 }
   0x2   :  { %2609 = sst [smem:[#allocation20_spill]] %s2594_s2 }
   0x3   :  { %2610 = sst [smem:[#allocation21_spill]] %s2595_s3 }
   0x4   :  { %10 = vsyncpa [#allocation4], 0 }
   0x5   :  { %11 = vsyncpa [#allocation7], 0 }
   0x6   :  { %13 = vsyncpa [#allocation7 + $0x1], 0 }
   0x7   :  { %14 = vsyncpa [#allocation10], 0 }
   0x8   :  { %16 = vsyncpa [#allocation10 + $0x1], 0 }
   0x9   :  { %17 = vsyncpa [#allocation5], 0  ;;  %s1990_s18 = smov 0   ;;  %s1992_s19 = smov 0  }
   0xa   :  { %s1994_s20 = smov 0   ;;  %s1996_s21 = smov 0  }
   0xb   :  { %s1998_s22 = smov 0   ;;  %s2000_s23 = smov 0  }
   0xc LB: > { %2611 = sst [smem:[#allocation17_spill]] %s1946_s22  ;;  %s32_s24 = sadd.s32 1, %s1946_s22  ;;  %s1950_s23 = sphi %s2000_s23, %s23_s23   ;;  %s1946_s22 = sphi %s1998_s22, %s2631_s22   ;;  %s1942_s21 = sphi %s1996_s21, %s2630_s21   ;;  %s1938_s20 = sphi %s1994_s20, %s2634_s20   ;;  %s1934_s19 = sphi %s1992_s19, %s2633_s19   ;;  %s1930_s18 = sphi %s1990_s18, %s2632_s18  }
   0xd   : > { %s68_s25 = sadd.s32 1, %s1938_s20  ;;  %p33_p0 = scmp.ge.s32.totalorder %s32_s24, 8 }
   0xe   : > { %p75_p1 = scmp.ne.s32.totalorder %s1938_s20, %s1934_s19  ;;  %p76_p2 = scmp.eq.s32.totalorder %s1950_s23, 0 }
   0xf   : > { %s2636_s24 = smov (%p33_p0, %s32_s24), 0  ;;  %p1640_p4 = scmp.lt.s32.totalorder %s1950_s23, 8 }
  0x10   : > { %2612 = sst [smem:[#allocation18_spill]] %s2636_s24  ;;  %p77_p3 = por %p76_p2, %p75_p1 }
  0x11   : > { %s65_s26 = ssub.s32 %s1946_s22, %s2636_s24  ;;  %s223_s27 = sand.u32 1, %s1950_s23  }
  0x12   : > { %p66_p5 = scmp.eq.s32.totalorder %s65_s26, 0  ;;  %s225_s28 = sand.u32 1, %s1938_s20  }
  0x13   : > { %s1338_s29 = sshll.u32 %s1946_s22, 15  ;;  %s1314_s6 = sshll.u32 %s225_s28, 11 }
  0x14   : > { %s2034_s30 = scalar_select %p66_p5, %s1938_s20, %s68_s25  }
  0x15   : > { %s2613_s1 = sld [smem:[#allocation19_spill]]  ;;  %p2041_p6 = pnand %p1640_p4, %p77_p3 }
  0x16   : > { %s227_s11 = scalar_lea.vmem [#allocation6], %s1314_s6  ;;  %s2047_s13 = sshll.u32 %s225_s28, 2 }
  0x17   : > { %s2614_s10 = scalar_select %p2041_p6, 1, 0 }
  0x18   : > { %s234_s12 = sshll.u32 %s227_s11, 4  ;;  %s2051_s14 = scalar_lea.sflag [#allocation7], %s223_s27  ;;  %s2045_s12 = int_to_ptr.vmem [resolvable:$true] %s234_s12 }
  0x19   : > { %p2057_p8 = pneg %p2041_p6 }
  0x1b   : > { %s2039_s9 = scalar_lea.hbm %s2613_s1, %s1338_s29  ;;  %s1719_s26 = scalar_lea.hbm %s2613_s1, 262144 }
  0x1c   : > { %s1714_s15 = scalar_lea.hbm %s2039_s9, 32768  ;;  %p1720_p11 = scmp.lt.u32.totalorder %s2039_s9, %s2613_s1 }
  0x1d   : > { %p1715_p7 = scmp.ne.s32.totalorder %s2039_s9, %s1714_s15  ;;  %p1721_p12 = scmp.lt.u32.totalorder %s1719_s26, %s1714_s15 }
  0x1e   : > { %s2615_s16 = scalar_select %p2057_p8, 1, 0 }
  0x1f   : > { %p1717_p9 = pnand %p2057_p8, %p1715_p7  ;;  %p1722_p13 = por %p1721_p12, %p1720_p11 }
  0x20   : > { %p1723_p0 = scmp.lt.u32.totalorder %s1714_s15, %s2039_s9 }
  0x21   : > { %p1718_p10 = pneg %p1717_p9 }
  0x22   : > { %p1724_p1 = por %p1723_p0, %p1722_p13 }
  0x24   : > { %p1725_p2 = pnand %p1724_p1, %p1718_p10 }
  0x26   : > { %1728 = shalt.err (!%p1725_p2)
}
  0x27   : > { %s1729_s6 = scalar_lea.vmem %s2045_s12, 32768  ;;  %s1952_s7 = smov [#allocation6]  }
  0x28   : > { %p1730_p3 = scmp.ne.s32.totalorder %s2045_s12, %s1729_s6  ;;  %s1734_s8 = sshll.u32 %s1952_s7, 4  ;;  %s1735_s8 = int_to_ptr.vmem [resolvable:$false] %s1734_s8 }
  0x29   : > { %s1736_s11 = scalar_lea.vmem %s1735_s8, 65536  ;;  %p1737_p7 = scmp.lt.s32.totalorder %s2045_s12, %s1735_s8 }
  0x2a   : > { %p1732_p4 = pnand %p1730_p3, %p2057_p8  ;;  %p1738_p9 = scmp.lt.s32.totalorder %s1736_s11, %s1729_s6 }
  0x2c   : > { %p1733_p5 = pneg %p1732_p4  ;;  %p1739_p11 = por %p1738_p9, %p1737_p7 }
  0x2e   : > { %p1740_p12 = pnand %p1739_p11, %p1733_p5 }
  0x30   : > { %1743 = shalt.err (!%p1740_p12)
}
  0x31   : > { %s1953_s15 = smov 512   ;;  %s1954_s17 = smov 32  }
  0x32   : > { %1629 = dma.hbm_to_vmem [thread:$0]  (!%p2041_p6), %s2039_s9, 32768, %s2045_s12, %s2051_s14, %s1953_s15, %s1953_s15, %s1954_s17  }
  0x33   : > { %s2082_s25 = sshll.u32 %s1946_s22, 6  ;;  %s2616_s3 = sld [smem:[#allocation21_spill]] }
  0x34   : > { %s267_s6 = scalar_lea.vmem [#allocation9], %s2047_s13  ;;  %s2093_s8 = scalar_lea.sflag [#allocation10], %s223_s27 }
  0x35   : > { %s275_s7 = sshll.u32 %s267_s6, 4  ;;  %s276_s7 = int_to_ptr.vmem [resolvable:$true] %s275_s7 }
  0x39   : > { %s2088_s29 = scalar_lea.hbm %s2616_s3, %s2082_s25  ;;  %s1749_s15 = scalar_lea.hbm %s2616_s3, 512 }
  0x3a   : > { %s1744_s11 = scalar_lea.hbm %s2088_s29, 64  ;;  %p1750_p1 = scmp.lt.u32.totalorder %s2088_s29, %s2616_s3 }
  0x3b   : > { %p1745_p10 = scmp.ne.s32.totalorder %s2088_s29, %s1744_s11  ;;  %p1751_p2 = scmp.lt.u32.totalorder %s1749_s15, %s1744_s11 }
  0x3c   : > { %p1753_p4 = scmp.lt.u32.totalorder %s1744_s11, %s2088_s29 }
  0x3d   : > { %p1747_p13 = pnand %p1745_p10, %p2057_p8  ;;  %p1752_p3 = por %p1751_p2, %p1750_p1 }
  0x3f   : > { %p1748_p0 = pneg %p1747_p13  ;;  %p1754_p5 = por %p1753_p4, %p1752_p3 }
  0x41   : > { %p1755_p7 = pnand %p1754_p5, %p1748_p0 }
  0x43   : > { %1758 = shalt.err (!%p1755_p7)
}
  0x44   : > { %s1759_s27 = scalar_lea.vmem %s276_s7, 64  ;;  %s1955_s28 = smov [#allocation9]  }
  0x45   : > { %p1760_p9 = scmp.ne.s32.totalorder %s276_s7, %s1759_s27  ;;  %s1764_s6 = sshll.u32 %s1955_s28, 4  ;;  %s1765_s6 = int_to_ptr.vmem [resolvable:$false] %s1764_s6 }
  0x46   : > { %s1766_s9 = scalar_lea.vmem %s1765_s6, 128  ;;  %p1767_p10 = scmp.lt.s32.totalorder %s276_s7, %s1765_s6 }
  0x47   : > { %p1762_p11 = pnand %p1760_p9, %p2057_p8  ;;  %p1768_p13 = scmp.lt.s32.totalorder %s1766_s9, %s1759_s27 }
  0x49   : > { %p1763_p12 = pneg %p1762_p11  ;;  %p1769_p6 = por %p1768_p13, %p1767_p10 }
  0x4b   : > { %p1770_p1 = pnand %p1769_p6, %p1763_p12 }
  0x4d   : > { %1773 = shalt.err (!%p1770_p1)
}
  0x4e   : > { %p2617_p2 = scmp.ne.s32.totalorder %s2614_s10, 0  ;;  %s2114_s11 = sadd.s32 4294967295, %s1950_s23  }
  0x4f   : > { %p81_p0 = scmp.ne.s32.totalorder %s1934_s19, %s1930_s18  ;;  %p2600_p6 = scmp.eq.s32.totalorder %s2114_s11, 0 }
  0x50   : > { %1635 = dma.hbm_to_vmem [thread:$0]  (!%p2617_p2), %s2088_s29, 64, %s276_s7, %s2093_s8  }
  0x51   : > { %p1311_p3 = scmp.ge.s32.totalorder %s1950_s23, 1  ;;  %p196_p4 = scmp.lt.s32.totalorder %s1950_s23, 9 }
  0x52   : > { %p2123_p5 = por %p2600_p6, %p81_p0  ;;  %s1956_s29 = smov [#allocation3]  }
  0x53   : > { %p2127_p7 = pnand %p1311_p3, %p196_p4  ;;  %s212_s7 = sshll.u32 %s1956_s29, 4  ;;  %s2131_s7 = int_to_ptr.vmem [resolvable:$true] %s212_s7 }
  0x54   : > { %s2618_s12 = scalar_select %p2123_p5, 1, 0 }
  0x55   : > { %s2619_s15 = scalar_select %p2127_p7, 1, 0 }
  0x56   : > { %p1622_p9 = pneg %p2127_p7  ;;  %s2620_s2 = sld [smem:[#allocation20_spill]] }
  0x57   : > { %s248_s27 = scalar_lea.vmem [#allocation8], %s2047_s13 }
  0x58   : > { %s256_s28 = sshll.u32 %s248_s27, 4  ;;  %p2144_p11 = pnand %p1622_p9, %p2600_p6  ;;  %s257_s28 = int_to_ptr.vmem [resolvable:$true] %s256_s28 }
  0x5a   : > { %s2621_s6 = scalar_select %p2144_p11, 1, 0 }
  0x5c   : > { %s2139_s26 = scalar_lea.hbm %s2620_s2, %s2082_s25  ;;  %s1779_s17 = scalar_lea.hbm %s2620_s2, 512 }
  0x5d   : > { %s1774_s9 = scalar_lea.hbm %s2139_s26, 64  ;;  %p1780_p1 = scmp.lt.u32.totalorder %s2139_s26, %s2620_s2 }
  0x5e   : > { %p1775_p12 = scmp.ne.s32.totalorder %s2139_s26, %s1774_s9  ;;  %p1781_p0 = scmp.lt.u32.totalorder %s1779_s17, %s1774_s9 }
  0x5f   : > { %p1783_p4 = scmp.lt.u32.totalorder %s1774_s9, %s2139_s26 }
  0x60   : > { %p1777_p10 = pnand %p1775_p12, %p2057_p8  ;;  %p1782_p3 = por %p1781_p0, %p1780_p1 }
  0x62   : > { %p1778_p13 = pneg %p1777_p10  ;;  %p1784_p9 = por %p1783_p4, %p1782_p3 }
  0x64   : > { %p1785_p6 = pnand %p1784_p9, %p1778_p13 }
  0x66   : > { %1788 = shalt.err (!%p1785_p6)
}
  0x67   : > { %s1789_s27 = scalar_lea.vmem %s257_s28, 64  ;;  %s1957_s24 = smov [#allocation8]  }
  0x68   : > { %p1790_p5 = scmp.ne.s32.totalorder %s257_s28, %s1789_s27  ;;  %s1794_s22 = sshll.u32 %s1957_s24, 4  ;;  %s1795_s22 = int_to_ptr.vmem [resolvable:$false] %s1794_s22 }
  0x69   : > { %s1796_s29 = scalar_lea.vmem %s1795_s22, 128  ;;  %p1797_p7 = scmp.lt.s32.totalorder %s257_s28, %s1795_s22 }
  0x6a   : > { %p1792_p12 = pnand %p1790_p5, %p2057_p8  ;;  %p1798_p11 = scmp.lt.s32.totalorder %s1796_s29, %s1789_s27 }
  0x6c   : > { %p1793_p10 = pneg %p1792_p12  ;;  %p1799_p2 = por %p1798_p11, %p1797_p7 }
  0x6e   : > { %p1800_p0 = pnand %p1799_p2, %p1793_p10 }
  0x70   : > { %1803 = shalt.err (!%p1800_p0)
}
  0x71   : > { %p2622_p1 = scmp.ne.s32.totalorder %s2614_s10, 0  ;;  %s2170_s9 = scalar_lea.hbm %s2596_s4, %s2082_s25 }
  0x72   : > { %s1804_s22 = scalar_lea.hbm %s2592_s0, 512  ;;  %p2623_p6 = scmp.ne.s32.totalorder %s2621_s6, 0 }
  0x73   : > { %1632 = dma.hbm_to_vmem [thread:$0]  (!%p2622_p1), %s2139_s26, 64, %s257_s28, %s2051_s14  }
  0x74   : > { %p1805_p2 = scmp.ne.s32.totalorder %s2592_s0, %s1804_s22  ;;  %p1806_p5 = pneg %p2623_p6 }
  0x75   : > { %p1811_p13 = scmp.lt.u32.totalorder %s1804_s22, %s2592_s0 }
  0x76   : > { %p1807_p7 = pnand %p1806_p5, %p1805_p2 }
  0x78   : > { %p1808_p11 = pneg %p1807_p7 }
  0x7a   : > { %p1813_p3 = pnand %p1811_p13, %p1808_p11 }
  0x7c   : > { %1816 = shalt.err (!%p1813_p3)
}
  0x7d   : > { %s1817_s14 = scalar_lea.vmem %s2131_s7, 512  ;;  %p1825_p10 = scmp.lt.s32.totalorder %s2131_s7, %s2131_s7 }
  0x7e   : > { %p1818_p4 = scmp.ne.s32.totalorder %s2131_s7, %s1817_s14  ;;  %p1826_p0 = scmp.lt.s32.totalorder %s1817_s14, %s1817_s14 }
  0x80   : > { %p1820_p9 = pnand %p1818_p4, %p1806_p5  ;;  %p1827_p1 = por %p1826_p0, %p1825_p10 }
  0x82   : > { %p1821_p12 = pneg %p1820_p9 }
  0x84   : > { %p1828_p8 = pnand %p1827_p1, %p1821_p12 }
  0x86   : > { %1831 = shalt.err (!%p1828_p8)
}
  0x87   : > { %1625 = dma.hbm_to_vmem [thread:$0]  (!%p2623_p6), %s2592_s0, 512, %s2131_s7, [#allocation4]  }
  0x88   : > { %s286_s26 = scalar_lea.vmem [#allocation11], %s2047_s13  ;;  %s1832_s1 = scalar_lea.hbm %s2170_s9, 64 }
  0x89   : > { %s294_s28 = sshll.u32 %s286_s26, 4  ;;  %p1833_p2 = scmp.ne.s32.totalorder %s2170_s9, %s1832_s1  ;;  %s295_s28 = int_to_ptr.vmem [resolvable:$true] %s294_s28 }
  0x8a   : > { %p2624_p1 = scmp.ne.s32.totalorder %s2615_s16, 0  ;;  %s1837_s24 = scalar_lea.hbm %s2596_s4, 512 }
  0x8b   : > { %p1838_p7 = scmp.lt.u32.totalorder %s2170_s9, %s2596_s4  ;;  %p1839_p11 = scmp.lt.u32.totalorder %s1837_s24, %s1832_s1 }
  0x8c   : > { %p1835_p8 = pnand %p1833_p2, %p2624_p1  ;;  %p1841_p3 = scmp.lt.u32.totalorder %s1832_s1, %s2170_s9 }
  0x8d   : > { %p1840_p13 = por %p1839_p11, %p1838_p7 }
  0x8e   : > { %p1836_p5 = pneg %p1835_p8 }
  0x8f   : > { %p1842_p6 = por %p1841_p3, %p1840_p13 }
  0x91   : > { %p1843_p4 = pnand %p1842_p6, %p1836_p5 }
  0x93   : > { %1846 = shalt.err (!%p1843_p4)
}
  0x94   : > { %s1847_s13 = scalar_lea.vmem %s295_s28, 64  ;;  %s1958_s7 = smov [#allocation11]  }
  0x95   : > { %p1848_p9 = scmp.ne.s32.totalorder %s295_s28, %s1847_s13  ;;  %s1852_s17 = sshll.u32 %s1958_s7, 4  ;;  %s1853_s17 = int_to_ptr.vmem [resolvable:$false] %s1852_s17 }
  0x96   : > { %s1854_s27 = scalar_lea.vmem %s1853_s17, 128  ;;  %p1855_p0 = scmp.lt.s32.totalorder %s295_s28, %s1853_s17 }
  0x97   : > { %p1850_p12 = pnand %p1848_p9, %p2624_p1  ;;  %p1856_p2 = scmp.lt.s32.totalorder %s1854_s27, %s1847_s13 }
  0x99   : > { %p1851_p10 = pneg %p1850_p12  ;;  %p1857_p8 = por %p1856_p2, %p1855_p0 }
  0x9b   : > { %p1858_p7 = pnand %p1857_p8, %p1851_p10 }
  0x9d   : > { %1861 = shalt.err (!%p1858_p7)
}
  0x9e   : > { %p2625_p11 = scmp.ne.s32.totalorder %s2614_s10, 0  ;;  %p2626_p5 = scmp.ne.s32.totalorder %s2619_s15, 0 }
  0x9f   : > { %p2627_p1 = scmp.eq.s32.totalorder (!%p2626_p5), %s2114_s11, 0 }
  0xa0   : > { %1638 = dma.hbm_to_vmem [thread:$0]  (!%p2625_p11), %s2170_s9, 64, %s295_s28, %s2093_s8  }
  0xa1   : > { %303 = sbr.rel (%p2626_p5) target bundleno = 942 (0x3ae), region = 40 }
  0xa8   : > { %1913 = dma.done.wait (%p2627_p1), [#allocation4], 512   ;;  %p2628_p13 = pmov %p2627_p1 }
  0xa9   : > { %s309_s16 = sand.u32 1, %s2114_s11   ;;  %s311_s29 = sand.u32 1, %s1934_s19  }
  0xaa   : > { %1915 = vsyncadd (%p2628_p13), [#allocation4], 4294966784  ;;  %s1328_s14 = sshll.u32 %s311_s29, 11  ;;  %s310_s2 = scalar_lea.sflag [#allocation7], %s309_s16 }
  0xab   : > { %s2220_s10 = scalar_lea.vmem [#allocation6], %s1328_s14  ;;  %p2629_p3 = scmp.ne.s32.totalorder %s2618_s12, 0 }
  0xad   : > { %1917 = dma.done.wait (%p2629_p3), %s310_s2, 32832  }
  0xae   : > { %1919 = vsyncadd (%p2629_p3), %s310_s2, 4294934464  ;;  %s2226_s8 = sshll.u32 %s311_s29, 2  ;;  %s328_s9 = scalar_lea.sflag [#allocation10], %s309_s16 }
  0xaf   : > { %s322_s15 = scalar_lea.vmem [#allocation8], %s2226_s8  ;;  %s331_s25 = scalar_lea.vmem [#allocation9], %s2226_s8 }
  0xb0   : > { %1921 = dma.done.wait (%p2629_p3), %s328_s9, 128  }
  0xb1   : > { %1923 = vsyncadd (%p2629_p3), %s328_s9, 4294967168  ;;  %s340_s26 = scalar_lea.vmem [#allocation11], %s2226_s8  ;;  %p1332_p6 = scmp.ne.s32.totalorder %s1942_s21, 0 }
  0xb2   : > { %v381_v0 = vld [vmem:[#allocation3] sm:$0xff] (!%p1332_p6)  ;;  %v382_v1 = vld [vmem:[#allocation3 + $0x8] sm:$0xff] (!%p1332_p6)  ;;  %v383_v2 = vld [vmem:[#allocation3 + $0x10] sm:$0xff] (!%p1332_p6) }
  0xb3   : > { %380 = sbr.rel (%p1332_p6) target bundleno = 186 (0xba), region = 64  ;;  %385 = vst [vmem:[#allocation2] sm:$0xff] (!%p1332_p6), %v381_v0  ;;  %386 = vst [vmem:[#allocation2 + $0x8] sm:$0xff] (!%p1332_p6), %v382_v1  ;;  %v384_v3 = vld [vmem:[#allocation3 + $0x18] sm:$0xff] (!%p1332_p6) }
  0xb4   : > { %387 = vst [vmem:[#allocation2 + $0x10] sm:$0xff] (!%p1332_p6), %v383_v2  ;;  %388 = vst [vmem:[#allocation2 + $0x18] sm:$0xff] (!%p1332_p6), %v384_v3 }
  0xba PF: > { %v394_v4 = vld [vmem:[%s2220_s10 + $0x8] sm:$0xff]  ;;  %v396_v6 = vld [vmem:[%s2220_s10 + $0x18] sm:$0xff]  ;;  %v393_v9 = vld [vmem:[%s2220_s10] sm:$0xff]  ;;  %p1333_p4 = scmp.ne.s32.totalorder %s1942_s21, 7 }
  0xbb   : > { %v398_v5 = vld [vmem:[%s2220_s10 + $0x28] sm:$0xff]  ;;  %v400_v8 = vld [vmem:[%s2220_s10 + $0x38] sm:$0xff]  ;;  %v397_v10 = vld [vmem:[%s2220_s10 + $0x20] sm:$0xff] }
  0xbc   : > { %v1342_v7 = vpack.c.bf16 %v398_v5, %v394_v4  ;;  %v1470_v11 = vpack.c.bf16 %v400_v8, %v396_v6  ;;  %v1344_v12 = vpack.c.bf16 %v397_v10, %v393_v9  ;;  %v395_v13 = vld [vmem:[%s2220_s10 + $0x10] sm:$0xff]  ;;  %v402_v15 = vld [vmem:[%s2220_s10 + $0x48] sm:$0xff]  ;;  %v404_v18 = vld [vmem:[%s2220_s10 + $0x58] sm:$0xff] }
  0xbd   : > { %v399_v14 = vld [vmem:[%s2220_s10 + $0x30] sm:$0xff]  ;;  %v406_v17 = vld [vmem:[%s2220_s10 + $0x68] sm:$0xff]  ;;  %v408_v19 = vld [vmem:[%s2220_s10 + $0x78] sm:$0xff] }
  0xbe   : > { %1343 = vmatprep.subr.bf16.mxu0 %v1342_v7  ;;  %v1472_v16 = vpack.c.bf16 %v399_v14, %v395_v13  ;;  %1471 = vmatprep.subr.bf16.mxu1 %v1470_v11  ;;  %v1346_v20 = vpack.c.bf16 %v406_v17, %v402_v15  ;;  %v1474_v21 = vpack.c.bf16 %v408_v19, %v404_v18  ;;  %v401_v22 = vld [vmem:[%s2220_s10 + $0x40] sm:$0xff]  ;;  %v403_v24 = vld [vmem:[%s2220_s10 + $0x50] sm:$0xff]  ;;  %v410_v27 = vld [vmem:[%s2220_s10 + $0x88] sm:$0xff] }
  0xbf   : > { %1345 = vmatpush1.bf16.msra.mxu0 %v1344_v12  ;;  %v405_v23 = vld [vmem:[%s2220_s10 + $0x60] sm:$0xff]  ;;  %v407_v26 = vld [vmem:[%s2220_s10 + $0x70] sm:$0xff]  ;;  %v414_v28 = vld [vmem:[%s2220_s10 + $0xa8] sm:$0xff] }
  0xc0   : > { %1473 = vmatpush1.bf16.msra.mxu1 %v1472_v16  ;;  %v1348_v25 = vpack.c.bf16 %v405_v23, %v401_v22  ;;  %1347 = vmatprep.subr.bf16.mxu0 %v1346_v20  ;;  %v1476_v29 = vpack.c.bf16 %v407_v26, %v403_v24  ;;  %v1350_v30 = vpack.c.bf16 %v414_v28, %v410_v27  ;;  %v412_v31 = vld [vmem:[%s2220_s10 + $0x98] sm:$0xff]  ;;  %v409_v33 = vld [vmem:[%s2220_s10 + $0x80] sm:$0xff]  ;;  %v411_v36 = vld [vmem:[%s2220_s10 + $0x90] sm:$0xff] }
  0xc1   : > { %1475 = vmatprep.subr.bf16.mxu1 %v1474_v21  ;;  %v416_v32 = vld [vmem:[%s2220_s10 + $0xb8] sm:$0xff]  ;;  %v413_v35 = vld [vmem:[%s2220_s10 + $0xa0] sm:$0xff]  ;;  %v415_v37 = vld [vmem:[%s2220_s10 + $0xb0] sm:$0xff] }
  0xc2   : > { %v1478_v34 = vpack.c.bf16 %v416_v32, %v412_v31  ;;  %v1352_v38 = vpack.c.bf16 %v413_v35, %v409_v33  ;;  %v418_v39 = vld [vmem:[%s2220_s10 + $0xc8] sm:$0xff]  ;;  %v420_v41 = vld [vmem:[%s2220_s10 + $0xd8] sm:$0xff]  ;;  %v1480_v42 = vpack.c.bf16 %v415_v37, %v411_v36  ;;  %v417_v45 = vld [vmem:[%s2220_s10 + $0xc0] sm:$0xff] }
  0xc3   : > { %1349 = vmatpush1.bf16.msra.mxu0 %v1348_v25  ;;  %v422_v40 = vld [vmem:[%s2220_s10 + $0xe8] sm:$0xff]  ;;  %v424_v44 = vld [vmem:[%s2220_s10 + $0xf8] sm:$0xff]  ;;  %v421_v46 = vld [vmem:[%s2220_s10 + $0xe0] sm:$0xff] }
  0xc4   : > { %1477 = vmatpush1.bf16.msra.mxu1 %v1476_v29  ;;  %1351 = vmatprep.subr.bf16.mxu0 %v1350_v30  ;;  %v1354_v43 = vpack.c.bf16 %v422_v40, %v418_v39  ;;  %v1482_v47 = vpack.c.bf16 %v424_v44, %v420_v41  ;;  %v419_v48 = vld [vmem:[%s2220_s10 + $0xd0] sm:$0xff]  ;;  %v426_v50 = vld [vmem:[%s2220_s10 + $0x108] sm:$0xff]  ;;  %v428_v52 = vld [vmem:[%s2220_s10 + $0x118] sm:$0xff]  ;;  %v1356_v54 = vpack.c.bf16 %v421_v46, %v417_v45 }
  0xc5   : > { %1479 = vmatprep.subr.bf16.mxu1 %v1478_v34  ;;  %v423_v49 = vld [vmem:[%s2220_s10 + $0xf0] sm:$0xff]  ;;  %v430_v51 = vld [vmem:[%s2220_s10 + $0x128] sm:$0xff]  ;;  %v432_v53 = vld [vmem:[%s2220_s10 + $0x138] sm:$0xff] }
  0xc6   : > { %v1484_v55 = vpack.c.bf16 %v423_v49, %v419_v48  ;;  %v1358_v56 = vpack.c.bf16 %v430_v51, %v426_v50  ;;  %v425_v57 = vld [vmem:[%s2220_s10 + $0x100] sm:$0xff]  ;;  %v427_v59 = vld [vmem:[%s2220_s10 + $0x110] sm:$0xff]  ;;  %v1486_v60 = vpack.c.bf16 %v432_v53, %v428_v52  ;;  %v434_v62 = vld [vmem:[%s2220_s10 + $0x148] sm:$0xff] }
  0xc7   : > { %1353 = vmatpush1.bf16.msra.mxu0 %v1352_v38  ;;  %v429_v58 = vld [vmem:[%s2220_s10 + $0x120] sm:$0xff]  ;;  %v431_v61 = vld [vmem:[%s2220_s10 + $0x130] sm:$0xff]  ;;  %v438_v63 = vld [vmem:[%s2220_s10 + $0x168] sm:$0xff] }
  0xc8   : > { %1481 = vmatpush1.bf16.msra.mxu1 %v1480_v42  ;;  %1355 = vmatprep.subr.bf16.mxu0 %v1354_v43  ;;  %v436_v0 = vld [vmem:[%s2220_s10 + $0x158] sm:$0xff]  ;;  %v1360_v2 = vpack.c.bf16 %v429_v58, %v425_v57  ;;  %v1488_v3 = vpack.c.bf16 %v431_v61, %v427_v59  ;;  %v1362_v4 = vpack.c.bf16 %v438_v63, %v434_v62  ;;  %v433_v5 = vld [vmem:[%s2220_s10 + $0x140] sm:$0xff]  ;;  %v435_v7 = vld [vmem:[%s2220_s10 + $0x150] sm:$0xff] }
  0xc9   : > { %1483 = vmatprep.subr.bf16.mxu1 %v1482_v47  ;;  %v440_v1 = vld [vmem:[%s2220_s10 + $0x178] sm:$0xff]  ;;  %v437_v6 = vld [vmem:[%s2220_s10 + $0x160] sm:$0xff]  ;;  %v439_v9 = vld [vmem:[%s2220_s10 + $0x170] sm:$0xff] }
  0xca   : > { %v1490_v8 = vpack.c.bf16 %v440_v1, %v436_v0  ;;  %v442_v10 = vld [vmem:[%s2220_s10 + $0x188] sm:$0xff]  ;;  %v444_v12 = vld [vmem:[%s2220_s10 + $0x198] sm:$0xff]  ;;  %v1364_v14 = vpack.c.bf16 %v437_v6, %v433_v5  ;;  %v1492_v15 = vpack.c.bf16 %v439_v9, %v435_v7  ;;  %v441_v17 = vld [vmem:[%s2220_s10 + $0x180] sm:$0xff] }
  0xcb   : > { %1357 = vmatpush1.bf16.msra.mxu0 %v1356_v54  ;;  %v446_v11 = vld [vmem:[%s2220_s10 + $0x1a8] sm:$0xff]  ;;  %v448_v13 = vld [vmem:[%s2220_s10 + $0x1b8] sm:$0xff]  ;;  %v445_v18 = vld [vmem:[%s2220_s10 + $0x1a0] sm:$0xff] }
  0xcc   : > { %1485 = vmatpush1.bf16.msra.mxu1 %v1484_v55  ;;  %1359 = vmatprep.subr.bf16.mxu0 %v1358_v56  ;;  %v1366_v16 = vpack.c.bf16 %v446_v11, %v442_v10  ;;  %v443_v19 = vld [vmem:[%s2220_s10 + $0x190] sm:$0xff]  ;;  %v1494_v20 = vpack.c.bf16 %v448_v13, %v444_v12  ;;  %v450_v22 = vld [vmem:[%s2220_s10 + $0x1c8] sm:$0xff]  ;;  %v452_v24 = vld [vmem:[%s2220_s10 + $0x1d8] sm:$0xff]  ;;  %v1368_v26 = vpack.c.bf16 %v445_v18, %v441_v17 }
  0xcd   : > { %1487 = vmatprep.subr.bf16.mxu1 %v1486_v60  ;;  %v447_v21 = vld [vmem:[%s2220_s10 + $0x1b0] sm:$0xff]  ;;  %v454_v23 = vld [vmem:[%s2220_s10 + $0x1e8] sm:$0xff]  ;;  %v456_v25 = vld [vmem:[%s2220_s10 + $0x1f8] sm:$0xff] }
  0xce   : > { %v1496_v27 = vpack.c.bf16 %v447_v21, %v443_v19  ;;  %v1370_v28 = vpack.c.bf16 %v454_v23, %v450_v22  ;;  %v449_v29 = vld [vmem:[%s2220_s10 + $0x1c0] sm:$0xff]  ;;  %v451_v31 = vld [vmem:[%s2220_s10 + $0x1d0] sm:$0xff]  ;;  %v1498_v32 = vpack.c.bf16 %v456_v25, %v452_v24  ;;  %v458_v34 = vld [vmem:[%s2220_s10 + $0x208] sm:$0xff] }
  0xcf   : > { %1361 = vmatpush1.bf16.msra.mxu0 %v1360_v2  ;;  %v453_v30 = vld [vmem:[%s2220_s10 + $0x1e0] sm:$0xff]  ;;  %v455_v33 = vld [vmem:[%s2220_s10 + $0x1f0] sm:$0xff]  ;;  %v462_v35 = vld [vmem:[%s2220_s10 + $0x228] sm:$0xff] }
  0xd0   : > { %1489 = vmatpush1.bf16.msra.mxu1 %v1488_v3  ;;  %1363 = vmatprep.subr.bf16.mxu0 %v1362_v4  ;;  %v460_v36 = vld [vmem:[%s2220_s10 + $0x218] sm:$0xff]  ;;  %v1372_v38 = vpack.c.bf16 %v453_v30, %v449_v29  ;;  %v1500_v39 = vpack.c.bf16 %v455_v33, %v451_v31  ;;  %v1374_v40 = vpack.c.bf16 %v462_v35, %v458_v34  ;;  %v457_v41 = vld [vmem:[%s2220_s10 + $0x200] sm:$0xff]  ;;  %v459_v43 = vld [vmem:[%s2220_s10 + $0x210] sm:$0xff] }
  0xd1   : > { %1491 = vmatprep.subr.bf16.mxu1 %v1490_v8  ;;  %v464_v37 = vld [vmem:[%s2220_s10 + $0x238] sm:$0xff]  ;;  %v461_v42 = vld [vmem:[%s2220_s10 + $0x220] sm:$0xff]  ;;  %v463_v45 = vld [vmem:[%s2220_s10 + $0x230] sm:$0xff] }
  0xd2   : > { %v1502_v44 = vpack.c.bf16 %v464_v37, %v460_v36  ;;  %v466_v46 = vld [vmem:[%s2220_s10 + $0x248] sm:$0xff]  ;;  %v468_v48 = vld [vmem:[%s2220_s10 + $0x258] sm:$0xff]  ;;  %v1376_v50 = vpack.c.bf16 %v461_v42, %v457_v41  ;;  %v1504_v51 = vpack.c.bf16 %v463_v45, %v459_v43  ;;  %v465_v53 = vld [vmem:[%s2220_s10 + $0x240] sm:$0xff] }
  0xd3   : > { %1365 = vmatpush1.bf16.msra.mxu0 %v1364_v14  ;;  %v470_v47 = vld [vmem:[%s2220_s10 + $0x268] sm:$0xff]  ;;  %v472_v49 = vld [vmem:[%s2220_s10 + $0x278] sm:$0xff]  ;;  %v469_v54 = vld [vmem:[%s2220_s10 + $0x260] sm:$0xff] }
  0xd4   : > { %1493 = vmatpush1.bf16.msra.mxu1 %v1492_v15  ;;  %1367 = vmatprep.subr.bf16.mxu0 %v1366_v16  ;;  %v1378_v52 = vpack.c.bf16 %v470_v47, %v466_v46  ;;  %v467_v55 = vld [vmem:[%s2220_s10 + $0x250] sm:$0xff]  ;;  %v1506_v56 = vpack.c.bf16 %v472_v49, %v468_v48  ;;  %v474_v58 = vld [vmem:[%s2220_s10 + $0x288] sm:$0xff]  ;;  %v476_v60 = vld [vmem:[%s2220_s10 + $0x298] sm:$0xff]  ;;  %v1380_v62 = vpack.c.bf16 %v469_v54, %v465_v53 }
  0xd5   : > { %1495 = vmatprep.subr.bf16.mxu1 %v1494_v20  ;;  %v471_v57 = vld [vmem:[%s2220_s10 + $0x270] sm:$0xff]  ;;  %v478_v59 = vld [vmem:[%s2220_s10 + $0x2a8] sm:$0xff]  ;;  %v480_v61 = vld [vmem:[%s2220_s10 + $0x2b8] sm:$0xff] }
  0xd6   : > { %v1508_v63 = vpack.c.bf16 %v471_v57, %v467_v55  ;;  %v1382_v0 = vpack.c.bf16 %v478_v59, %v474_v58  ;;  %v473_v1 = vld [vmem:[%s2220_s10 + $0x280] sm:$0xff]  ;;  %v475_v3 = vld [vmem:[%s2220_s10 + $0x290] sm:$0xff]  ;;  %v1510_v4 = vpack.c.bf16 %v480_v61, %v476_v60  ;;  %v482_v6 = vld [vmem:[%s2220_s10 + $0x2c8] sm:$0xff] }
  0xd7   : > { %1369 = vmatpush1.bf16.msra.mxu0 %v1368_v26  ;;  %v477_v2 = vld [vmem:[%s2220_s10 + $0x2a0] sm:$0xff]  ;;  %v479_v5 = vld [vmem:[%s2220_s10 + $0x2b0] sm:$0xff]  ;;  %v486_v7 = vld [vmem:[%s2220_s10 + $0x2e8] sm:$0xff] }
  0xd8   : > { %1497 = vmatpush1.bf16.msra.mxu1 %v1496_v27  ;;  %1371 = vmatprep.subr.bf16.mxu0 %v1370_v28  ;;  %v484_v8 = vld [vmem:[%s2220_s10 + $0x2d8] sm:$0xff]  ;;  %v1384_v10 = vpack.c.bf16 %v477_v2, %v473_v1  ;;  %v481_v11 = vld [vmem:[%s2220_s10 + $0x2c0] sm:$0xff]  ;;  %v1512_v12 = vpack.c.bf16 %v479_v5, %v475_v3  ;;  %v1386_v13 = vpack.c.bf16 %v486_v7, %v482_v6  ;;  %v483_v15 = vld [vmem:[%s2220_s10 + $0x2d0] sm:$0xff] }
  0xd9   : > { %1499 = vmatprep.subr.bf16.mxu1 %v1498_v32  ;;  %v488_v9 = vld [vmem:[%s2220_s10 + $0x2f8] sm:$0xff]  ;;  %v485_v14 = vld [vmem:[%s2220_s10 + $0x2e0] sm:$0xff]  ;;  %v487_v16 = vld [vmem:[%s2220_s10 + $0x2f0] sm:$0xff] }
  0xda   : > { %v1514_v17 = vpack.c.bf16 %v488_v9, %v484_v8  ;;  %v490_v18 = vld [vmem:[%s2220_s10 + $0x308] sm:$0xff]  ;;  %v492_v21 = vld [vmem:[%s2220_s10 + $0x318] sm:$0xff]  ;;  %v1388_v23 = vpack.c.bf16 %v485_v14, %v481_v11  ;;  %v1516_v24 = vpack.c.bf16 %v487_v16, %v483_v15  ;;  %v489_v26 = vld [vmem:[%s2220_s10 + $0x300] sm:$0xff] }
  0xdb   : > { %1373 = vmatpush1.bf16.msra.mxu0 %v1372_v38  ;;  %v494_v19 = vld [vmem:[%s2220_s10 + $0x328] sm:$0xff]  ;;  %v496_v22 = vld [vmem:[%s2220_s10 + $0x338] sm:$0xff]  ;;  %v493_v27 = vld [vmem:[%s2220_s10 + $0x320] sm:$0xff] }
  0xdc   : > { %1501 = vmatpush1.bf16.msra.mxu1 %v1500_v39  ;;  %1375 = vmatprep.subr.bf16.mxu0 %v1374_v40  ;;  %v390_v20 = vld [vmem:[#allocation2 + $0x8] sm:$0xff]  ;;  %v1390_v25 = vpack.c.bf16 %v494_v19, %v490_v18  ;;  %v491_v28 = vld [vmem:[%s2220_s10 + $0x310] sm:$0xff]  ;;  %v1518_v29 = vpack.c.bf16 %v496_v22, %v492_v21  ;;  %v500_v33 = vld [vmem:[%s2220_s10 + $0x358] sm:$0xff]  ;;  %v1392_v35 = vpack.c.bf16 %v493_v27, %v489_v26 }
  0xdd   : > { %1503 = vmatprep.subr.bf16.mxu1 %v1502_v44  ;;  %735 = vmatprep.mubr.f32.mxu0 %v390_v20  ;;  %v495_v30 = vld [vmem:[%s2220_s10 + $0x330] sm:$0xff]  ;;  %v498_v31 = vld [vmem:[%s2220_s10 + $0x348] sm:$0xff]  ;;  %v504_v34 = vld [vmem:[%s2220_s10 + $0x378] sm:$0xff] }
  0xde   : > { %877 = vmatprep.mubr.f32.mxu1 %v390_v20  ;;  %v502_v32 = vld [vmem:[%s2220_s10 + $0x368] sm:$0xff]  ;;  %v1520_v36 = vpack.c.bf16 %v495_v30, %v491_v28  ;;  %v497_v38 = vld [vmem:[%s2220_s10 + $0x340] sm:$0xff]  ;;  %v499_v40 = vld [vmem:[%s2220_s10 + $0x350] sm:$0xff]  ;;  %v1522_v41 = vpack.c.bf16 %v504_v34, %v500_v33 }
  0xdf   : > { %1377 = vmatpush1.bf16.msra.mxu0 %v1376_v50  ;;  %v1394_v37 = vpack.c.bf16 %v502_v32, %v498_v31  ;;  %v501_v39 = vld [vmem:[%s2220_s10 + $0x360] sm:$0xff]  ;;  %v503_v42 = vld [vmem:[%s2220_s10 + $0x370] sm:$0xff]  ;;  %v506_v43 = vld [vmem:[%s2220_s10 + $0x388] sm:$0xff] }
  0xe0   : > { %1505 = vmatpush1.bf16.msra.mxu1 %v1504_v51  ;;  %1379 = vmatprep.subr.bf16.mxu0 %v1378_v52  ;;  %v510_v44 = vld [vmem:[%s2220_s10 + $0x3a8] sm:$0xff]  ;;  %v508_v45 = vld [vmem:[%s2220_s10 + $0x398] sm:$0xff]  ;;  %v1396_v47 = vpack.c.bf16 %v501_v39, %v497_v38  ;;  %v1524_v48 = vpack.c.bf16 %v503_v42, %v499_v40  ;;  %v505_v50 = vld [vmem:[%s2220_s10 + $0x380] sm:$0xff] }
  0xe1   : > { %1507 = vmatprep.subr.bf16.mxu1 %v1506_v56  ;;  %v512_v46 = vld [vmem:[%s2220_s10 + $0x3b8] sm:$0xff]  ;;  %v1398_v49 = vpack.c.bf16 %v510_v44, %v506_v43  ;;  %v509_v51 = vld [vmem:[%s2220_s10 + $0x3a0] sm:$0xff]  ;;  %v507_v52 = vld [vmem:[%s2220_s10 + $0x390] sm:$0xff] }
  0xe2   : > { %v1526_v53 = vpack.c.bf16 %v512_v46, %v508_v45  ;;  %v511_v54 = vld [vmem:[%s2220_s10 + $0x3b0] sm:$0xff]  ;;  %v514_v55 = vld [vmem:[%s2220_s10 + $0x3c8] sm:$0xff]  ;;  %v516_v57 = vld [vmem:[%s2220_s10 + $0x3d8] sm:$0xff]  ;;  %v1400_v59 = vpack.c.bf16 %v509_v51, %v505_v50 }
  0xe3   : > { %1381 = vmatpush1.bf16.msra.mxu0 %v1380_v62  ;;  %v518_v56 = vld [vmem:[%s2220_s10 + $0x3e8] sm:$0xff]  ;;  %v520_v58 = vld [vmem:[%s2220_s10 + $0x3f8] sm:$0xff]  ;;  %v1528_v60 = vpack.c.bf16 %v511_v54, %v507_v52  ;;  %v513_v62 = vld [vmem:[%s2220_s10 + $0x3c0] sm:$0xff] }
  0xe4   : > { %1509 = vmatpush1.bf16.msra.mxu1 %v1508_v63  ;;  %1383 = vmatprep.subr.bf16.mxu0 %v1382_v0  ;;  %v1402_v61 = vpack.c.bf16 %v518_v56, %v514_v55  ;;  %v517_v63 = vld [vmem:[%s2220_s10 + $0x3e0] sm:$0xff]  ;;  %v515_v0 = vld [vmem:[%s2220_s10 + $0x3d0] sm:$0xff]  ;;  %v1530_v1 = vpack.c.bf16 %v520_v58, %v516_v57  ;;  %v522_v3 = vld [vmem:[%s2220_s10 + $0x408] sm:$0xff] }
  0xe5   : > { %1511 = vmatprep.subr.bf16.mxu1 %v1510_v4  ;;  %v519_v2 = vld [vmem:[%s2220_s10 + $0x3f0] sm:$0xff]  ;;  %v526_v4 = vld [vmem:[%s2220_s10 + $0x428] sm:$0xff]  ;;  %v524_v5 = vld [vmem:[%s2220_s10 + $0x418] sm:$0xff]  ;;  %v1404_v7 = vpack.c.bf16 %v517_v63, %v513_v62 }
  0xe6   : > { %v528_v6 = vld [vmem:[%s2220_s10 + $0x438] sm:$0xff]  ;;  %v1532_v8 = vpack.c.bf16 %v519_v2, %v515_v0  ;;  %v1406_v9 = vpack.c.bf16 %v526_v4, %v522_v3  ;;  %v525_v11 = vld [vmem:[%s2220_s10 + $0x420] sm:$0xff]  ;;  %v527_v14 = vld [vmem:[%s2220_s10 + $0x430] sm:$0xff] }
  0xe7   : > { %1385 = vmatpush1.bf16.msra.mxu0 %v1384_v10  ;;  %v521_v10 = vld [vmem:[%s2220_s10 + $0x400] sm:$0xff]  ;;  %v530_v15 = vld [vmem:[%s2220_s10 + $0x448] sm:$0xff]  ;;  %v536_v18 = vld [vmem:[%s2220_s10 + $0x478] sm:$0xff] }
  0xe8   : > { %1513 = vmatpush1.bf16.msra.mxu1 %v1512_v12  ;;  %1387 = vmatprep.subr.bf16.mxu0 %v1386_v13  ;;  %v523_v12 = vld [vmem:[%s2220_s10 + $0x410] sm:$0xff]  ;;  %v1534_v13 = vpack.c.bf16 %v528_v6, %v524_v5  ;;  %v534_v16 = vld [vmem:[%s2220_s10 + $0x468] sm:$0xff]  ;;  %v389_v19 = vld [vmem:[#allocation2] sm:$0xff]  ;;  %v1408_v20 = vpack.c.bf16 %v525_v11, %v521_v10 }
  0xe9   : > { %1515 = vmatprep.subr.bf16.mxu1 %v1514_v17  ;;  %v532_v17 = vld [vmem:[%s2220_s10 + $0x458] sm:$0xff]  ;;  %v1536_v21 = vpack.c.bf16 %v527_v14, %v523_v12  ;;  %v1410_v22 = vpack.c.bf16 %v534_v16, %v530_v15  ;;  %v535_v27 = vld [vmem:[%s2220_s10 + $0x470] sm:$0xff]  ;;  %v538_v28 = vld [vmem:[%s2220_s10 + $0x488] sm:$0xff] }
  0xea   : > { %v1538_v26 = vpack.c.bf16 %v536_v18, %v532_v17  ;;  %v540_v30 = vld [vmem:[%s2220_s10 + $0x498] sm:$0xff]  ;;  %v543_v39 = vld [vmem:[%s2220_s10 + $0x4b0] sm:$0xff]  ;;  %v546_v40 = vld [vmem:[%s2220_s10 + $0x4c8] sm:$0xff] }
  0xeb   : > { %1389 = vmatpush1.bf16.msra.mxu0 %v1388_v23  ;;  %v529_v23 = vld [vmem:[%s2220_s10 + $0x440] sm:$0xff]  ;;  %v544_v31 = vld [vmem:[%s2220_s10 + $0x4b8] sm:$0xff]  ;;  %v551_v51 = vld [vmem:[%s2220_s10 + $0x4f0] sm:$0xff] }
  0xec   : > { %1517 = vmatpush1.bf16.msra.mxu1 %v1516_v24  ;;  %1391 = vmatprep.subr.bf16.mxu0 %v1390_v25  ;;  %v533_v24 = vld [vmem:[%s2220_s10 + $0x460] sm:$0xff]  ;;  %v531_v25 = vld [vmem:[%s2220_s10 + $0x450] sm:$0xff]  ;;  %v1542_v38 = vpack.c.bf16 %v544_v31, %v540_v30  ;;  %v548_v42 = vld [vmem:[%s2220_s10 + $0x4d8] sm:$0xff] }
  0xed   : > { %1519 = vmatprep.subr.bf16.mxu1 %v1518_v29  ;;  %v542_v29 = vld [vmem:[%s2220_s10 + $0x4a8] sm:$0xff]  ;;  %v1412_v32 = vpack.c.bf16 %v533_v24, %v529_v23  ;;  %v1540_v33 = vpack.c.bf16 %v535_v27, %v531_v25  ;;  %v552_v43 = vld [vmem:[%s2220_s10 + $0x4f8] sm:$0xff]  ;;  %v559_v63 = vld [vmem:[%s2220_s10 + $0x530] sm:$0xff] }
  0xee   : > { %v1414_v34 = vpack.c.bf16 %v542_v29, %v538_v28  ;;  %v1546_v50 = vpack.c.bf16 %v552_v43, %v548_v42  ;;  %v554_v52 = vld [vmem:[%s2220_s10 + $0x508] sm:$0xff]  ;;  %v556_v54 = vld [vmem:[%s2220_s10 + $0x518] sm:$0xff]  ;;  %v567_v11 = vld [vmem:[%s2220_s10 + $0x570] sm:$0xff] }
  0xef   : > { %1393 = vmatpush1.bf16.msra.mxu0 %v1392_v35  ;;  %v537_v35 = vld [vmem:[%s2220_s10 + $0x480] sm:$0xff]  ;;  %v560_v55 = vld [vmem:[%s2220_s10 + $0x538] sm:$0xff]  ;;  %v562_v0 = vld [vmem:[%s2220_s10 + $0x548] sm:$0xff] }
  0xf0   : > { %1521 = vmatpush1.bf16.msra.mxu1 %v1520_v36  ;;  %1395 = vmatprep.subr.bf16.mxu0 %v1394_v37  ;;  %v541_v36 = vld [vmem:[%s2220_s10 + $0x4a0] sm:$0xff]  ;;  %v539_v37 = vld [vmem:[%s2220_s10 + $0x490] sm:$0xff]  ;;  %v1550_v62 = vpack.c.bf16 %v560_v55, %v556_v54  ;;  %v564_v2 = vld [vmem:[%s2220_s10 + $0x558] sm:$0xff] }
  0xf1   : > { %1523 = vmatprep.subr.bf16.mxu1 %v1522_v41  ;;  %v550_v41 = vld [vmem:[%s2220_s10 + $0x4e8] sm:$0xff]  ;;  %v1416_v44 = vpack.c.bf16 %v541_v36, %v537_v35  ;;  %v1544_v45 = vpack.c.bf16 %v543_v39, %v539_v37  ;;  %v568_v3 = vld [vmem:[%s2220_s10 + $0x578] sm:$0xff]  ;;  %v569_v17 = vld [vmem:[%s2220_s10 + $0x580] sm:$0xff] }
  0xf2   : > { %v1418_v46 = vpack.c.bf16 %v550_v41, %v546_v40  ;;  %v1554_v10 = vpack.c.bf16 %v568_v3, %v564_v2  ;;  %v570_v12 = vld [vmem:[%s2220_s10 + $0x588] sm:$0xff]  ;;  %v572_v14 = vld [vmem:[%s2220_s10 + $0x598] sm:$0xff]  ;;  %v583_v36 = vld [vmem:[%s2220_s10 + $0x5f0] sm:$0xff] }
  0xf3   : > { %1397 = vmatpush1.bf16.msra.mxu0 %v1396_v47  ;;  %v545_v47 = vld [vmem:[%s2220_s10 + $0x4c0] sm:$0xff]  ;;  %v576_v15 = vld [vmem:[%s2220_s10 + $0x5b8] sm:$0xff]  ;;  %v578_v24 = vld [vmem:[%s2220_s10 + $0x5c8] sm:$0xff] }
  0xf4   : > { %1525 = vmatpush1.bf16.msra.mxu1 %v1524_v48  ;;  %1399 = vmatprep.subr.bf16.mxu0 %v1398_v49  ;;  %v549_v48 = vld [vmem:[%s2220_s10 + $0x4e0] sm:$0xff]  ;;  %v547_v49 = vld [vmem:[%s2220_s10 + $0x4d0] sm:$0xff]  ;;  %v1558_v23 = vpack.c.bf16 %v576_v15, %v572_v14  ;;  %v582_v25 = vld [vmem:[%s2220_s10 + $0x5e8] sm:$0xff] }
  0xf5   : > { %1527 = vmatprep.subr.bf16.mxu1 %v1526_v53  ;;  %v558_v53 = vld [vmem:[%s2220_s10 + $0x528] sm:$0xff]  ;;  %v1420_v56 = vpack.c.bf16 %v549_v48, %v545_v47  ;;  %v1548_v57 = vpack.c.bf16 %v551_v51, %v547_v49  ;;  %v580_v27 = vld [vmem:[%s2220_s10 + $0x5d8] sm:$0xff]  ;;  %v1434_v31 = vpack.c.bf16 %v582_v25, %v578_v24  ;;  %v591_v48 = vld [vmem:[%s2220_s10 + $0x630] sm:$0xff] }
  0xf6   : > { %v1422_v58 = vpack.c.bf16 %v558_v53, %v554_v52  ;;  %v584_v28 = vld [vmem:[%s2220_s10 + $0x5f8] sm:$0xff]  ;;  %v586_v37 = vld [vmem:[%s2220_s10 + $0x608] sm:$0xff] }
  0xf7   : > { %1401 = vmatpush1.bf16.msra.mxu0 %v1400_v59  ;;  %v553_v59 = vld [vmem:[%s2220_s10 + $0x500] sm:$0xff]  ;;  %v1562_v35 = vpack.c.bf16 %v584_v28, %v580_v27  ;;  %v588_v39 = vld [vmem:[%s2220_s10 + $0x618] sm:$0xff]  ;;  %v594_v49 = vld [vmem:[%s2220_s10 + $0x648] sm:$0xff] }
  0xf8   : > { %1529 = vmatpush1.bf16.msra.mxu1 %v1528_v60  ;;  %1403 = vmatprep.subr.bf16.mxu0 %v1402_v61  ;;  %v557_v60 = vld [vmem:[%s2220_s10 + $0x520] sm:$0xff]  ;;  %v555_v61 = vld [vmem:[%s2220_s10 + $0x510] sm:$0xff]  ;;  %v592_v40 = vld [vmem:[%s2220_s10 + $0x638] sm:$0xff] }
  0xf9   : > { %1531 = vmatprep.subr.bf16.mxu1 %v1530_v1  ;;  %v566_v1 = vld [vmem:[%s2220_s10 + $0x568] sm:$0xff]  ;;  %v1424_v4 = vpack.c.bf16 %v557_v60, %v553_v59  ;;  %v1552_v5 = vpack.c.bf16 %v559_v63, %v555_v61  ;;  %v1566_v47 = vpack.c.bf16 %v592_v40, %v588_v39  ;;  %v596_v51 = vld [vmem:[%s2220_s10 + $0x658] sm:$0xff]  ;;  %v599_v60 = vld [vmem:[%s2220_s10 + $0x670] sm:$0xff] }
  0xfa   : > { %v1426_v6 = vpack.c.bf16 %v566_v1, %v562_v0  ;;  %v600_v52 = vld [vmem:[%s2220_s10 + $0x678] sm:$0xff]  ;;  %v602_v61 = vld [vmem:[%s2220_s10 + $0x688] sm:$0xff]  ;;  %v617_v28 = vld [vmem:[%s2220_s10 + $0x700] sm:$0xff] }
  0xfb   : > { %1405 = vmatpush1.bf16.msra.mxu0 %v1404_v7  ;;  %v561_v7 = vld [vmem:[%s2220_s10 + $0x540] sm:$0xff]  ;;  %v1570_v59 = vpack.c.bf16 %v600_v52, %v596_v51  ;;  %v604_v63 = vld [vmem:[%s2220_s10 + $0x698] sm:$0xff] }
  0xfc   : > { %1533 = vmatpush1.bf16.msra.mxu1 %v1532_v8  ;;  %1407 = vmatprep.subr.bf16.mxu0 %v1406_v9  ;;  %v565_v8 = vld [vmem:[%s2220_s10 + $0x560] sm:$0xff]  ;;  %v563_v9 = vld [vmem:[%s2220_s10 + $0x550] sm:$0xff]  ;;  %v608_v0 = vld [vmem:[%s2220_s10 + $0x6b8] sm:$0xff] }
  0xfd   : > { %1535 = vmatprep.subr.bf16.mxu1 %v1534_v13  ;;  %v574_v13 = vld [vmem:[%s2220_s10 + $0x5a8] sm:$0xff]  ;;  %v1428_v16 = vpack.c.bf16 %v565_v8, %v561_v7  ;;  %v1556_v18 = vpack.c.bf16 %v567_v11, %v563_v9  ;;  %v1574_v7 = vpack.c.bf16 %v608_v0, %v604_v63  ;;  %v607_v8 = vld [vmem:[%s2220_s10 + $0x6b0] sm:$0xff]  ;;  %v612_v11 = vld [vmem:[%s2220_s10 + $0x6d8] sm:$0xff] }
  0xfe   : > { %736 = vmatmul.mubr.f32.vlgmr.msra.gmra.mrb[0].mxu0 %v389_v19  ;;  %v610_v9 = vld [vmem:[%s2220_s10 + $0x6c8] sm:$0xff]  ;;  %v624_v24 = vld [vmem:[%s2220_s10 + $0x738] sm:$0xff]  ;;  %v625_v40 = vld [vmem:[%s2220_s10 + $0x740] sm:$0xff] }
  0xff   : > { %1409 = vmatpush1.bf16.msra.mxu0 %v1408_v20  ;;  %878 = vmatmul.mubr.f32.vlgmr.msra.gmra.mrb[0].mxu1 %v389_v19  ;;  %v1430_v19 = vpack.c.bf16 %v574_v13, %v570_v12  ;;  %v573_v20 = vld [vmem:[%s2220_s10 + $0x5a0] sm:$0xff]  ;;  %v616_v12 = vld [vmem:[%s2220_s10 + $0x6f8] sm:$0xff] }
 0x100   : > { %1537 = vmatpush1.bf16.msra.mxu1 %v1536_v21  ;;  %1411 = vmatprep.subr.bf16.mxu0 %v1410_v22  ;;  %v571_v21 = vld [vmem:[%s2220_s10 + $0x590] sm:$0xff]  ;;  %v1432_v29 = vpack.c.bf16 %v573_v20, %v569_v17  ;;  %v613_v17 = vld [vmem:[%s2220_s10 + $0x6e0] sm:$0xff] }
 0x101   : > { %1539 = vmatprep.subr.bf16.mxu1 %v1538_v26  ;;  %v575_v22 = vld [vmem:[%s2220_s10 + $0x5b0] sm:$0xff]  ;;  %v392_v26 = vld [vmem:[#allocation2 + $0x18] sm:$0xff]  ;;  %v633_v52 = vld [vmem:[%s2220_s10 + $0x780] sm:$0xff] }
 0x102   : > { %806 = vmatprep.mubr.f32.mxu0 %v392_v26  ;;  %948 = vmatprep.mubr.f32.mxu1 %v392_v26  ;;  %v1560_v30 = vpack.c.bf16 %v575_v22, %v571_v21  ;;  %v615_v20 = vld [vmem:[%s2220_s10 + $0x6f0] sm:$0xff]  ;;  %v618_v21 = vld [vmem:[%s2220_s10 + $0x708] sm:$0xff]  ;;  %v641_v0 = vld [vmem:[%s2220_s10 + $0x7c0] sm:$0xff] }
 0x103   : > { %1413 = vmatpush1.bf16.msra.mxu0 %v1412_v32  ;;  %v577_v32 = vld [vmem:[%s2220_s10 + $0x5c0] sm:$0xff]  ;;  %v622_v22 = vld [vmem:[%s2220_s10 + $0x728] sm:$0xff] }
 0x104   : > { %1541 = vmatpush1.bf16.msra.mxu1 %v1540_v33  ;;  %1415 = vmatprep.subr.bf16.mxu0 %v1414_v34  ;;  %v581_v33 = vld [vmem:[%s2220_s10 + $0x5e0] sm:$0xff]  ;;  %v579_v34 = vld [vmem:[%s2220_s10 + $0x5d0] sm:$0xff]  ;;  %v1454_v27 = vpack.c.bf16 %v622_v22, %v618_v21 }
 0x105   : > { %1543 = vmatprep.subr.bf16.mxu1 %v1542_v38  ;;  %v590_v38 = vld [vmem:[%s2220_s10 + $0x628] sm:$0xff]  ;;  %v1436_v41 = vpack.c.bf16 %v581_v33, %v577_v32  ;;  %v1564_v42 = vpack.c.bf16 %v583_v36, %v579_v34  ;;  %v623_v32 = vld [vmem:[%s2220_s10 + $0x730] sm:$0xff]  ;;  %v632_v36 = vld [vmem:[%s2220_s10 + $0x778] sm:$0xff] }
 0x106   : > { %v1438_v43 = vpack.c.bf16 %v590_v38, %v586_v37  ;;  %v626_v33 = vld [vmem:[%s2220_s10 + $0x748] sm:$0xff] }
 0x107   : > { %1417 = vmatpush1.bf16.msra.mxu0 %v1416_v44  ;;  %v585_v44 = vld [vmem:[%s2220_s10 + $0x600] sm:$0xff]  ;;  %v630_v34 = vld [vmem:[%s2220_s10 + $0x768] sm:$0xff] }
 0x108   : > { %1545 = vmatpush1.bf16.msra.mxu1 %v1544_v45  ;;  %1419 = vmatprep.subr.bf16.mxu0 %v1418_v46  ;;  %v589_v45 = vld [vmem:[%s2220_s10 + $0x620] sm:$0xff]  ;;  %v587_v46 = vld [vmem:[%s2220_s10 + $0x610] sm:$0xff]  ;;  %v1458_v39 = vpack.c.bf16 %v630_v34, %v626_v33 }
 0x109   : > { %1547 = vmatprep.subr.bf16.mxu1 %v1546_v50  ;;  %v598_v50 = vld [vmem:[%s2220_s10 + $0x668] sm:$0xff]  ;;  %v1440_v53 = vpack.c.bf16 %v589_v45, %v585_v44  ;;  %v1568_v54 = vpack.c.bf16 %v591_v48, %v587_v46  ;;  %v631_v44 = vld [vmem:[%s2220_s10 + $0x770] sm:$0xff]  ;;  %v640_v48 = vld [vmem:[%s2220_s10 + $0x7b8] sm:$0xff] }
 0x10a   : > { %v1442_v55 = vpack.c.bf16 %v598_v50, %v594_v49  ;;  %v634_v45 = vld [vmem:[%s2220_s10 + $0x788] sm:$0xff] }
 0x10b   : > { %1421 = vmatpush1.bf16.msra.mxu0 %v1420_v56  ;;  %v593_v56 = vld [vmem:[%s2220_s10 + $0x640] sm:$0xff]  ;;  %v638_v46 = vld [vmem:[%s2220_s10 + $0x7a8] sm:$0xff] }
 0x10c   : > { %1549 = vmatpush1.bf16.msra.mxu1 %v1548_v57  ;;  %1423 = vmatprep.subr.bf16.mxu0 %v1422_v58  ;;  %v597_v57 = vld [vmem:[%s2220_s10 + $0x660] sm:$0xff]  ;;  %v595_v58 = vld [vmem:[%s2220_s10 + $0x650] sm:$0xff]  ;;  %v1462_v51 = vpack.c.bf16 %v638_v46, %v634_v45 }
 0x10d   : > { %1551 = vmatprep.subr.bf16.mxu1 %v1550_v62  ;;  %v606_v62 = vld [vmem:[%s2220_s10 + $0x6a8] sm:$0xff]  ;;  %v1444_v1 = vpack.c.bf16 %v597_v57, %v593_v56  ;;  %v1572_v2 = vpack.c.bf16 %v599_v60, %v595_v58  ;;  %v639_v56 = vld [vmem:[%s2220_s10 + $0x7b0] sm:$0xff]  ;;  %v648_v60 = vld [vmem:[%s2220_s10 + $0x7f8] sm:$0xff] }
 0x10e   : > { %v1446_v3 = vpack.c.bf16 %v606_v62, %v602_v61  ;;  %v642_v57 = vld [vmem:[%s2220_s10 + $0x7c8] sm:$0xff] }
 0x10f   : > { %1425 = vmatpush1.bf16.msra.mxu0 %v1424_v4  ;;  %v601_v4 = vld [vmem:[%s2220_s10 + $0x680] sm:$0xff]  ;;  %v646_v58 = vld [vmem:[%s2220_s10 + $0x7e8] sm:$0xff] }
 0x110   : > { %1553 = vmatpush1.bf16.msra.mxu1 %v1552_v5  ;;  %1427 = vmatprep.subr.bf16.mxu0 %v1426_v6  ;;  %v605_v5 = vld [vmem:[%s2220_s10 + $0x6a0] sm:$0xff]  ;;  %v603_v6 = vld [vmem:[%s2220_s10 + $0x690] sm:$0xff]  ;;  %v1466_v63 = vpack.c.bf16 %v646_v58, %v642_v57 }
 0x111   : > { %1555 = vmatprep.subr.bf16.mxu1 %v1554_v10  ;;  %v614_v10 = vld [vmem:[%s2220_s10 + $0x6e8] sm:$0xff]  ;;  %v1448_v13 = vpack.c.bf16 %v605_v5, %v601_v4  ;;  %v1576_v14 = vpack.c.bf16 %v607_v8, %v603_v6  ;;  %v647_v4 = vld [vmem:[%s2220_s10 + $0x7f0] sm:$0xff]  ;;  %v651_v8 = vlaneseq }
 0x112   : > { %v1450_v15 = vpack.c.bf16 %v614_v10, %v610_v9 }
 0x113   : > { %1429 = vmatpush1.bf16.msra.mxu0 %v1428_v16  ;;  %v609_v16 = vld [vmem:[%s2220_s10 + $0x6c0] sm:$0xff]  ;;  %v652_v9 = vshrl.u32 %v651_v8, 7 }
 0x114   : > { %1557 = vmatpush1.bf16.msra.mxu1 %v1556_v18  ;;  %1431 = vmatprep.subr.bf16.mxu0 %v1430_v19  ;;  %v611_v18 = vld [vmem:[%s2220_s10 + $0x6d0] sm:$0xff]  ;;  %v1578_v19 = vpack.c.bf16 %v616_v12, %v612_v11  ;;  %v1452_v25 = vpack.c.bf16 %v613_v17, %v609_v16  ;;  %v649_v11 = vld [vmem:[%s322_s15] sm:$0xf] }
 0x115   : > { %1559 = vmatprep.subr.bf16.mxu1 %v1558_v23  ;;  %v620_v23 = vld [vmem:[%s2220_s10 + $0x718] sm:$0xff]  ;;  %v1580_v26 = vpack.c.bf16 %v615_v20, %v611_v18  ;;  %v2492_v10 = vsub.s32 0, %v652_v9  ;;  %v2496_v12 = vsub.s32 2, %v652_v9 }
 0x117   : > { %1433 = vmatpush1.bf16.msra.mxu0 %v1432_v29  ;;  %v621_v29 = vld [vmem:[%s2220_s10 + $0x720] sm:$0xff]  ;;  %v662_v16 = vrot.slane %v649_v11, %v2496_v12 }
 0x118   : > { %1561 = vmatpush1.bf16.msra.mxu1 %v1560_v30  ;;  %1435 = vmatprep.subr.bf16.mxu0 %v1434_v31  ;;  %v619_v30 = vld [vmem:[%s2220_s10 + $0x710] sm:$0xff]  ;;  %v1582_v31 = vpack.c.bf16 %v624_v24, %v620_v23  ;;  %v1456_v37 = vpack.c.bf16 %v621_v29, %v617_v28 }
 0x119   : > { %1563 = vmatprep.subr.bf16.mxu1 %v1562_v35  ;;  %v628_v35 = vld [vmem:[%s2220_s10 + $0x758] sm:$0xff]  ;;  %v1584_v38 = vpack.c.bf16 %v623_v32, %v619_v30 }
 0x11b   : > { %1437 = vmatpush1.bf16.msra.mxu0 %v1436_v41  ;;  %v629_v41 = vld [vmem:[%s2220_s10 + $0x760] sm:$0xff] }
 0x11c   : > { %1565 = vmatpush1.bf16.msra.mxu1 %v1564_v42  ;;  %1439 = vmatprep.subr.bf16.mxu0 %v1438_v43  ;;  %v627_v42 = vld [vmem:[%s2220_s10 + $0x750] sm:$0xff]  ;;  %v1586_v43 = vpack.c.bf16 %v632_v36, %v628_v35  ;;  %v1460_v49 = vpack.c.bf16 %v629_v41, %v625_v40 }
 0x11d   : > { %1567 = vmatprep.subr.bf16.mxu1 %v1566_v47  ;;  %v636_v47 = vld [vmem:[%s2220_s10 + $0x798] sm:$0xff]  ;;  %v1588_v50 = vpack.c.bf16 %v631_v44, %v627_v42 }
 0x11f   : > { %1441 = vmatpush1.bf16.msra.mxu0 %v1440_v53  ;;  %v637_v53 = vld [vmem:[%s2220_s10 + $0x7a0] sm:$0xff] }
 0x120   : > { %1569 = vmatpush1.bf16.msra.mxu1 %v1568_v54  ;;  %1443 = vmatprep.subr.bf16.mxu0 %v1442_v55  ;;  %v635_v54 = vld [vmem:[%s2220_s10 + $0x790] sm:$0xff]  ;;  %v1590_v55 = vpack.c.bf16 %v640_v48, %v636_v47  ;;  %v1464_v61 = vpack.c.bf16 %v637_v53, %v633_v52 }
 0x121   : > { %1571 = vmatprep.subr.bf16.mxu1 %v1570_v59  ;;  %v644_v59 = vld [vmem:[%s2220_s10 + $0x7d8] sm:$0xff]  ;;  %v1592_v62 = vpack.c.bf16 %v639_v56, %v635_v54 }
 0x123   : > { %1445 = vmatpush1.bf16.msra.mxu0 %v1444_v1  ;;  %v645_v1 = vld [vmem:[%s2220_s10 + $0x7e0] sm:$0xff] }
 0x124   : > { %1573 = vmatpush1.bf16.msra.mxu1 %v1572_v2  ;;  %1447 = vmatprep.subr.bf16.mxu0 %v1446_v3  ;;  %v1594_v2 = vpack.c.bf16 %v648_v60, %v644_v59  ;;  %v643_v3 = vld [vmem:[%s2220_s10 + $0x7d0] sm:$0xff]  ;;  %v1468_v5 = vpack.c.bf16 %v645_v1, %v641_v0 }
 0x125   : > { %1575 = vmatprep.subr.bf16.mxu1 %v1574_v7  ;;  %v1596_v6 = vpack.c.bf16 %v647_v4, %v643_v3  ;;  %v391_v7 = vld [vmem:[#allocation2 + $0x10] sm:$0xff] }
 0x127   : > { %1449 = vmatpush1.bf16.msra.mxu0 %v1448_v13  ;;  %v2498_v13 = vsub.s32 1, %v652_v9 }
 0x128   : > { %1577 = vmatpush1.bf16.msra.mxu1 %v1576_v14  ;;  %1451 = vmatprep.subr.bf16.mxu0 %v1450_v15  ;;  %v2500_v14 = vsub.s32 3, %v652_v9  ;;  %v654_v15 = vrot.slane %v649_v11, %v2492_v10 }
 0x129   : > { %1579 = vmatprep.subr.bf16.mxu1 %v1578_v19  ;;  %v658_v17 = vrot.slane %v649_v11, %v2498_v13 }
 0x12a   : > { %v666_v18 = vrot.slane %v649_v11, %v2500_v14 }
 0x12b   : > { %1453 = vmatpush1.bf16.msra.mxu0 %v1452_v25 }
 0x12c   : > { %1581 = vmatpush1.bf16.msra.mxu1 %v1580_v26  ;;  %1455 = vmatprep.subr.bf16.mxu0 %v1454_v27 }
 0x12d   : > { %1583 = vmatprep.subr.bf16.mxu1 %v1582_v31 }
 0x12f   : > { %1457 = vmatpush1.bf16.msra.mxu0 %v1456_v37 }
 0x130   : > { %1585 = vmatpush1.bf16.msra.mxu1 %v1584_v38  ;;  %1459 = vmatprep.subr.bf16.mxu0 %v1458_v39 }
 0x131   : > { %1587 = vmatprep.subr.bf16.mxu1 %v1586_v43 }
 0x133   : > { %1461 = vmatpush1.bf16.msra.mxu0 %v1460_v49 }
 0x134   : > { %1589 = vmatpush1.bf16.msra.mxu1 %v1588_v50  ;;  %1463 = vmatprep.subr.bf16.mxu0 %v1462_v51 }
 0x135   : > { %1591 = vmatprep.subr.bf16.mxu1 %v1590_v55 }
 0x137   : > { %1465 = vmatpush1.bf16.msra.mxu0 %v1464_v61 }
 0x138   : > { %1593 = vmatpush1.bf16.msra.mxu1 %v1592_v62  ;;  %1467 = vmatprep.subr.bf16.mxu0 %v1466_v63 }
 0x139   : > { %1595 = vmatprep.subr.bf16.mxu1 %v1594_v2 }
 0x13b   : > { %1469 = vmatpush1.bf16.msra.mxu0 %v1468_v5 }
 0x13c   : > { %1597 = vmatpush1.bf16.msra.mxu1 %v1596_v6 }
 0x13e   : > { %807 = vmatmul.mubr.f32.vlgmr.msra.gmra.mrb[0].mxu0 %v391_v7 }
 0x13f   : > { %949 = vmatmul.mubr.f32.vlgmr.msra.gmra.mrb[0].mxu1 %v391_v7 }
 0x211   : > { %v808_v19 = vpop.f32.mrb[0].mxu0 }
 0x212   : > { %v1598_v20 = vadd.f32 %v808_v19, %v654_v15  ;;  %v950_v21 = vpop.f32.mrb[0].mxu1  ;;  %v810_v22 = vpop.f32.mrb[1].mxu0 }
 0x213   : > { %v1600_v23 = vadd.f32 %v950_v21, %v662_v16  ;;  %v1599_v24 = vadd.f32 %v810_v22, %v658_v17  ;;  %v952_v25 = vpop.f32.mrb[1].mxu1 }
 0x214   : > { %v2506_v26 = vmul.f32 0.1, %v1598_v20  ;;  %v1601_v27 = vadd.f32 %v952_v25, %v666_v18 }
 0x215   : > { %v2508_v28 = vmul.f32 0.1, %v1600_v23  ;;  %v2510_v29 = vmul.f32 0.1, %v1599_v24 }
 0x216   : > { %v2513_v30 = vmul.f32 0.70710677, %v2506_v26  ;;  %v2515_v31 = vmul.f32 0.1, %v1601_v27 }
 0x217   : > { %v2518_v32 = vmul.f32 0.70710677, %v2508_v28  ;;  %v2521_v33 = vmul.f32 0.70710677, %v2510_v29 }
 0x218   : > { %v967_v34 = vand.u32 2147483647, %v2513_v30  ;;  %v2525_v35 = vmul.f32 0.70710677, %v2515_v31  ;;  %vm1047_vm0 = vcmp.ge.f32.partialorder %v2513_v30, 0.0 }
 0x219   : > { %v969_v36 = vand.u32 2147483647, %v2518_v32  ;;  %v968_v37 = vand.u32 2147483647, %v2521_v33  ;;  %vm1049_vm1 = vcmp.ge.f32.partialorder %v2518_v32, 0.0  ;;  %vm1048_vm2 = vcmp.ge.f32.partialorder %v2521_v33, 0.0 }
 0x21a   : > { %v971_v38 = vmul.f32 0.3275911, %v967_v34  ;;  %v970_v39 = vand.u32 2147483647, %v2525_v35  ;;  %v1023_v47 = vsub.f32 0.0, %v967_v34  ;;  %vm1050_vm3 = vcmp.ge.f32.partialorder %v2525_v35, 0.0 }
 0x21b   : > { %v973_v40 = vmul.f32 0.3275911, %v969_v36  ;;  %v972_v41 = vmul.f32 0.3275911, %v968_v37  ;;  %v1025_v48 = vsub.f32 0.0, %v969_v36  ;;  %v1024_v51 = vsub.f32 0.0, %v968_v37 }
 0x21c   : > { %v975_v42 = vadd.f32 1.0, %v971_v38  ;;  %v974_v43 = vmul.f32 0.3275911, %v970_v39  ;;  %v1027_v50 = vmul.f32 %v1023_v47, %v967_v34  ;;  %v1026_v55 = vsub.f32 0.0, %v970_v39 }
 0x21d   : > { %v977_v44 = vadd.f32 1.0, %v973_v40  ;;  %v976_v45 = vadd.f32 1.0, %v972_v41  ;;  %v1029_v54 = vmul.f32 %v1025_v48, %v969_v36  ;;  %v1028_v60 = vmul.f32 %v1024_v51, %v968_v37 }
 0x21e   : > { %1696 = vrcp.f32 %v975_v42  ;;  %v978_v46 = vadd.f32 1.0, %v974_v43  ;;  %v1031_v59 = vmul.f32 1.442695, %v1027_v50  ;;  %v1030_v2 = vmul.f32 %v1026_v55, %v970_v39 }
 0x21f   : > { %1698 = vrcp.f32 %v977_v44  ;;  %v1035_v63 = vmul.f32 1.442695, %v1029_v54  ;;  %v1033_v7 = vmul.f32 1.442695, %v1028_v60 }
 0x220   : > { %1700 = vrcp.f32 %v976_v45  ;;  %v1037_v16 = vmul.f32 1.442695, %v1030_v2 }
 0x221   : > { %1702 = vrcp.f32 %v978_v46 }
 0x222   : > { %1704 = vpow2.f32 %v1031_v59 }
 0x223   : > { %1706 = vpow2.f32 %v1035_v63 }
 0x224   : > { %1708 = vpow2.f32 %v1033_v7 }
 0x225   : > { %1710 = vpow2.f32 %v1037_v16 }
 0x228   : > { %v1697_v49 = vpop.eup %1696 }
 0x229   : > { %v1699_v52 = vpop.eup %1698  ;;  %v987_v53 = vmul.f32 1.0614054, %v1697_v49 }
 0x22a   : > { %v989_v56 = vmul.f32 1.0614054, %v1699_v52  ;;  %v1701_v58 = vpop.eup %1700 }
 0x22b   : > { %v991_v57 = vadd.f32 -1.4531521, %v987_v53  ;;  %v988_v0 = vmul.f32 1.0614054, %v1701_v58  ;;  %v1703_v1 = vpop.eup %1702 }
 0x22c   : > { %v993_v61 = vadd.f32 -1.4531521, %v989_v56  ;;  %v990_v6 = vmul.f32 1.0614054, %v1703_v1  ;;  %v1705_v41 = vpop.eup %1704 }
 0x22d   : > { %v995_v62 = vmul.f32 %v1697_v49, %v991_v57  ;;  %v992_v5 = vadd.f32 -1.4531521, %v988_v0  ;;  %v1707_v43 = vpop.eup %1706 }
 0x22e   : > { %v997_v3 = vmul.f32 %v1699_v52, %v993_v61  ;;  %v994_v15 = vadd.f32 -1.4531521, %v990_v6  ;;  %v1709_v53 = vpop.eup %1708 }
 0x22f   : > { %v999_v4 = vadd.f32 1.4214138, %v995_v62  ;;  %v996_v11 = vmul.f32 %v1701_v58, %v992_v5  ;;  %v1711_v59 = vpop.eup %1710 }
 0x230   : > { %v1001_v8 = vadd.f32 1.4214138, %v997_v3  ;;  %v998_v20 = vmul.f32 %v1703_v1, %v994_v15  ;;  %v960_v3 = vmul.f32 0.5, %v2510_v29 }
 0x231   : > { %v1003_v9 = vmul.f32 %v1697_v49, %v999_v4  ;;  %v1000_v19 = vadd.f32 1.4214138, %v996_v11  ;;  %v962_v11 = vmul.f32 0.5, %v2515_v31 }
 0x232   : > { %v1005_v17 = vmul.f32 %v1699_v52, %v1001_v8  ;;  %v1002_v24 = vadd.f32 1.4214138, %v998_v20  ;;  %v961_v8 = vmul.f32 0.5, %v2508_v28 }
 0x233   : > { %v1007_v18 = vadd.f32 -0.28449672, %v1003_v9  ;;  %v1004_v23 = vmul.f32 %v1701_v58, %v1000_v19 }
 0x234   : > { %v1009_v21 = vadd.f32 -0.28449672, %v1005_v17  ;;  %v1006_v36 = vmul.f32 %v1703_v1, %v1002_v24 }
 0x235   : > { %v1011_v22 = vmul.f32 %v1697_v49, %v1007_v18  ;;  %v1008_v34 = vadd.f32 -0.28449672, %v1004_v23 }
 0x236   : > { %v1013_v25 = vmul.f32 %v1699_v52, %v1009_v21  ;;  %v1010_v40 = vadd.f32 -0.28449672, %v1006_v36 }
 0x237   : > { %v1015_v27 = vadd.f32 0.2548296, %v1011_v22  ;;  %v1012_v39 = vmul.f32 %v1701_v58, %v1008_v34 }
 0x238   : > { %v1017_v37 = vadd.f32 0.2548296, %v1013_v25  ;;  %v1014_v46 = vmul.f32 %v1703_v1, %v1010_v40 }
 0x239   : > { %v1019_v38 = vmul.f32 %v1697_v49, %v1015_v27  ;;  %v1016_v45 = vadd.f32 0.2548296, %v1012_v39  ;;  %v1120_v39 = vld [vmem:[%s340_s26] sm:$0xf] }
 0x23a   : > { %v1021_v42 = vmul.f32 %v1699_v52, %v1017_v37  ;;  %v1018_v51 = vadd.f32 0.2548296, %v1014_v46  ;;  %v1133_v46 = vrot.slane %v1120_v39, %v2496_v12 }
 0x23b   : > { %v1039_v44 = vmul.f32 %v1705_v41, %v1019_v38  ;;  %v1020_v50 = vmul.f32 %v1701_v58, %v1016_v45  ;;  %v959_v58 = vmul.f32 0.5, %v2506_v26  ;;  %v1094_v38 = vld [vmem:[%s331_s25] sm:$0xf]  ;;  %v1125_v45 = vrot.slane %v1120_v39, %v2492_v10 }
 0x23c   : > { %v1041_v47 = vmul.f32 %v1707_v43, %v1021_v42  ;;  %v1022_v57 = vmul.f32 %v1703_v1, %v1018_v51  ;;  %v1099_v40 = vrot.slane %v1094_v38, %v2492_v10  ;;  %v1107_v41 = vrot.slane %v1094_v38, %v2496_v12 }
 0x23d   : > { %v1043_v48 = vsub.f32 1.0, %v1039_v44  ;;  %v1040_v56 = vmul.f32 %v1709_v53, %v1020_v50  ;;  %v1103_v42 = vrot.slane %v1094_v38, %v2498_v13  ;;  %v1111_v43 = vrot.slane %v1094_v38, %v2500_v14 }
 0x23e   : > { %v1045_v54 = vsub.f32 1.0, %v1041_v47  ;;  %v1042_v52 = vmul.f32 %v1711_v59, %v1022_v57  ;;  %v1129_v47 = vrot.slane %v1120_v39, %v2498_v13 }
 0x23f   : > { %v1051_v55 = vsub.f32 0.0, %v1043_v48  ;;  %v1044_v61 = vsub.f32 1.0, %v1040_v56 }
 0x240   : > { %v1053_v49 = vsub.f32 0.0, %v1045_v54  ;;  %v1046_v0 = vsub.f32 1.0, %v1042_v52 }
 0x241   : > { %v1055_v60 = vsel %vm1047_vm0, %v1043_v48, %v1051_v55  ;;  %v1052_v63 = vsub.f32 0.0, %v1044_v61  ;;  %v1137_v48 = vrot.slane %v1120_v39, %v2500_v14 }
 0x242   : > { %v1059_v62 = vadd.f32 1.0, %v1055_v60  ;;  %v1057_v2 = vsel %vm1049_vm1, %v1045_v54, %v1053_v49  ;;  %v1054_v4 = vsub.f32 0.0, %v1046_v0 }
 0x243   : > { %v1056_v1 = vsel %vm1048_vm2, %v1044_v61, %v1052_v63  ;;  %v1061_v6 = vadd.f32 1.0, %v1057_v2 }
 0x244   : > { %v1063_v5 = vmul.f32 %v1059_v62, %v959_v58  ;;  %v1060_v30 = vadd.f32 1.0, %v1056_v1  ;;  %v1058_v7 = vsel %vm1050_vm3, %v1046_v0, %v1054_v4 }
 0x245   : > { %v1062_v9 = vadd.f32 1.0, %v1058_v7  ;;  %v1065_v15 = vmul.f32 %v1061_v6, %v961_v8 }
 0x246   : > { %v1064_v32 = vmul.f32 %v1060_v30, %v960_v3 }
 0x247   : > { %v1066_v16 = vmul.f32 %v1062_v9, %v962_v11 }
 0x248   : > { %v1067_v26 = vadd.f32 %v1064_v32, %v1063_v5 }
 0x24a   : > { %v1068_v33 = vadd.f32 %v1067_v26, %v1065_v15 }
 0x24c   : > { %v1069_v17 = vadd.f32 %v1068_v33, %v1066_v16 }
 0x24e   : > { %1070 = vadd.xlane.f32.xlu0 %v1069_v17 }
 0x2db   : > { %v1071_v29 = vpop.xlane.xlu0 %1070 }
 0x2dc   : > { %v1073_v18 = vmul.f32 0.001953125, %v1071_v29 }
 0x2de   : > { %v1074_v19 = vsub.f32 %v1063_v5, %v1073_v18  ;;  %v1075_v20 = vsub.f32 %v1064_v32, %v1073_v18  ;;  %v1076_v35 = vsub.f32 %v1065_v15, %v1073_v18  ;;  %v1077_v21 = vsub.f32 %v1066_v16, %v1073_v18 }
 0x2e0   : > { %v1078_v22 = vmul.f32 %v1074_v19, %v1074_v19  ;;  %v1079_v28 = vmul.f32 %v1075_v20, %v1075_v20  ;;  %v1080_v23 = vmul.f32 %v1076_v35, %v1076_v35  ;;  %v1081_v25 = vmul.f32 %v1077_v21, %v1077_v21 }
 0x2e2   : > { %v1082_v24 = vadd.f32 %v1079_v28, %v1078_v22 }
 0x2e4   : > { %v1083_v31 = vadd.f32 %v1082_v24, %v1080_v23 }
 0x2e6   : > { %v1084_v27 = vadd.f32 %v1083_v31, %v1081_v25 }
 0x2e8   : > { %1085 = vadd.xlane.f32.xlu0 %v1084_v27 }
 0x375   : > { %v1086_v34 = vpop.xlane.xlu0 %1085 }
 0x376   : > { %v1087_v36 = vmul.f32 0.001953125, %v1086_v34 }
 0x378   : > { %v1088_v37 = vadd.f32 1e-05, %v1087_v36 }
 0x37a   : > { %1712 = vrsqrt.f32 %v1088_v37 }
 0x384   : > { %v1713_v44 = vpop.eup %1712 }
 0x385   : > { %v1090_v50 = vmul.f32 %v1713_v44, %v1074_v19  ;;  %v1091_v51 = vmul.f32 %v1713_v44, %v1075_v20  ;;  %v1092_v53 = vmul.f32 %v1713_v44, %v1076_v35  ;;  %v1093_v54 = vmul.f32 %v1713_v44, %v1077_v21 }
 0x386   : > { %1153 = sbr.rel (%p1333_p4) target bundleno = 917 (0x395), region = 68 }
 0x387   : > { %v1116_v55 = vmul.f32 %v1099_v40, %v1090_v50  ;;  %v1117_v56 = vmul.f32 %v1103_v42, %v1091_v51  ;;  %v1118_v57 = vmul.f32 %v1107_v41, %v1092_v53  ;;  %v1119_v59 = vmul.f32 %v1111_v43, %v1093_v54 }
 0x389   : > { %v1142_v49 = vadd.f32 %v1125_v45, %v1116_v55  ;;  %v1143_v60 = vadd.f32 %v1129_v47, %v1117_v56  ;;  %v1144_v61 = vadd.f32 %v1133_v46, %v1118_v57  ;;  %v1145_v52 = vadd.f32 %v1137_v48, %v1119_v59 }
 0x38b   : > { %1146 = vst [vmem:[#allocation2] sm:$0xff] %v1142_v49  ;;  %1147 = vst [vmem:[#allocation2 + $0x8] sm:$0xff] %v1143_v60 }
 0x38c   : > { %1148 = vst [vmem:[#allocation2 + $0x10] sm:$0xff] %v1144_v61  ;;  %1149 = vst [vmem:[#allocation2 + $0x18] sm:$0xff] %v1145_v52 }
 0x392   : > { %v1154_v10 = vld [vmem:[#allocation2] sm:$0xff]  ;;  %v1155_v12 = vld [vmem:[#allocation2 + $0x8] sm:$0xff] }
 0x393   : > { %v1156_v13 = vld [vmem:[#allocation2 + $0x10] sm:$0xff]  ;;  %1158 = vst [vmem:[#allocation12] sm:$0xff] %v1154_v10  ;;  %1159 = vst [vmem:[#allocation12 + $0x8] sm:$0xff] %v1155_v12  ;;  %v1157_v14 = vld [vmem:[#allocation2 + $0x18] sm:$0xff] }
 0x394   : > { %1160 = vst [vmem:[#allocation12 + $0x10] sm:$0xff] %v1156_v13  ;;  %1161 = vst [vmem:[#allocation12 + $0x18] sm:$0xff] %v1157_v14 }
 0x395 PF: > { %p1642_p9 = scmp.eq.s32.totalorder %s2114_s11, 7  ;;  %s1959_s12 = smov [#allocation12]  }
 0x396   : > { %s1172_s28 = sshll.u32 %s1959_s12, 4  ;;  %s1173_s28 = int_to_ptr.vmem [resolvable:$true] %s1172_s28 }
 0x397   : > { %s1862_s1 = scalar_lea.vmem %s1173_s28, 512  ;;  %p1869_p2 = scmp.lt.s32.totalorder %s1173_s28, %s1173_s28 }
 0x398   : > { %p1863_p12 = scmp.ne.s32.totalorder %s1173_s28, %s1862_s1  ;;  %p1870_p8 = scmp.lt.s32.totalorder %s1862_s1, %s1862_s1 }
 0x39a   : > { %p1864_p10 = pnand %p1863_p12, %p1642_p9  ;;  %p1871_p7 = por %p1870_p8, %p1869_p2 }
 0x39c   : > { %p1865_p0 = pneg %p1864_p10 }
 0x39e   : > { %p1872_p11 = pnand %p1871_p7, %p1865_p0 }
 0x3a0   : > { %1875 = shalt.err (!%p1872_p11)
}
 0x3a1   : > { %s1876_s3 = scalar_lea.hbm %s2597_s5, 512 }
 0x3a2   : > { %p1877_p5 = scmp.ne.s32.totalorder %s2597_s5, %s1876_s3  ;;  %p1882_p3 = scmp.lt.u32.totalorder %s1876_s3, %s2597_s5 }
 0x3a4   : > { %p1878_p1 = pnand %p1877_p5, %p1642_p9 }
 0x3a6   : > { %p1879_p13 = pneg %p1878_p1 }
 0x3a8   : > { %p1884_p6 = pnand %p1882_p3, %p1879_p13 }
 0x3aa   : > { %1887 = shalt.err (!%p1884_p6)
}
 0x3ab   : > { %1619 = dma.vmem_to_hbm [thread:$0]  (%p1642_p9), %s1173_s28, 512, %s2597_s5, [#allocation5]  }
 0x3ac   : > { %1925 = dma.done.wait (%p1642_p9), [#allocation5], 512  }
 0x3ad   : > { %1927 = vsyncadd (%p1642_p9), [#allocation5], 4294966784 }
 0x3ae PF: > { %s23_s23 = sadd.s32 1, %s1950_s23   ;;  %s2630_s21 = sld [smem:[#allocation17_spill]] }
 0x3af   : > { %p20_p4 = scmp.ge.s32.totalorder %s23_s23, 10   ;;  %s2631_s22 = sld [smem:[#allocation18_spill]] }
 0x3b0   : > { %s2632_s18 = smov %s1934_s19  ;;  %s2633_s19 = smov %s1938_s20 }
 0x3b1   : > { %s2634_s20 = smov %s2034_s30  ;;  %22 = sbr.rel (!%p20_p4) target bundleno = 12 (0xc), region = 127 }
 0x3b8   :  { %1185 = vsyncpa [#allocation4], 1 }
 0x3b9   :  { %1187 = vsyncpa [#allocation4 + $0x1], 1 }
 0x3ba   :  { %1188 = vsyncpa [#allocation7], 1 }
 0x3bb   :  { %1190 = vsyncpa [#allocation7 + $0x1], 1 }
 0x3bc   :  { %1191 = vsyncpa [#allocation10], 1 }
 0x3bd   :  { %1193 = vsyncpa [#allocation10 + $0x1], 1 }
 0x3be   :  { %1194 = vsyncpa [#allocation5], 1 }
 0x3bf   :  { %1196 = vsyncpa [#allocation5 + $0x1], 1 }

</bundles_post_ra>
